<compile_context>
chip_gen: v7x
topology: tpu7x:2x2x1
jax: 0.10.0
libtpu: 0.0.40
codegen_flags: <defaults>
</compile_context>

<pallas_src>
import math
import functools

import jax
import jax.numpy as jnp
from jax.experimental import pallas as pl
from jax.experimental.pallas import tpu as pltpu

PAD_ID = 0          # T5 pad_token_id == decoder_start_token_id
NEG_INF = -1e9      # large negative mask value (kept in f32)
LN_EPS = 1e-6       # T5LayerNorm eps

# bf16 MXU inputs (2-4x MXU throughput on v6e/v7x, half the weight/emb DMA bytes);
# accumulation stays f32 via preferred_element_type.
MXU_DTYPE = jnp.bfloat16


def _rmsnorm(x, w):
    var = jnp.mean(x * x, axis=-1, keepdims=True)
    return x * jax.lax.rsqrt(var + LN_EPS) * w


def _pick_tile(n, pref):
    """Largest tile <= pref that divides n and is a multiple of 8 (else n)."""
    if n <= pref:
        return n
    t = (pref // 8) * 8
    while t >= 8:
        if n % t == 0:
            return t
        t -= 8
    return n


# ---------------------------------------------------------------------------
# Kernel 1: fused attention block (one grid step per batch item, "parallel")
#   out = x + Wo( softmax(Q K^T + pos_bias + mask) V ),  Q/K/V from RMSNorm(x)
#   (for cross-attention, K/V come from the raw (final-normed) encoder output)
# ---------------------------------------------------------------------------

def _attn_block_kernel(*refs, H, DK, self_attn, causal, has_pbias):
    it = iter(refs)
    xq_ref = next(it)
    xkv_ref = None if self_attn else next(it)
    lnw_ref = next(it)
    wqkv_ref = next(it)
    wo_ref = next(it)
    pbias_ref = next(it) if has_pbias else None
    amask_ref = next(it)
    o_ref = next(it)

    x = xq_ref[...]                                   # [1, Tq, D] f32
    _, Tq, D = x.shape
    HD = H * DK
    x2 = x.reshape(Tq, D)

    # fused T5LayerNorm prologue (f32), cast ONCE for the MXU
    nq = _rmsnorm(x2, lnw_ref[...]).astype(MXU_DTYPE)

    wqkv = wqkv_ref[...]                              # [D, 3*H*DK] bf16
    if self_attn:
        Tk = Tq
        # single fused QKV matmul, f32 accumulation
        qkv = jnp.dot(nq, wqkv, preferred_element_type=jnp.float32)      # [Tq, 3HD]
        q2d, k2d, v2d = qkv[:, :HD], qkv[:, HD:2 * HD], qkv[:, 2 * HD:]
    else:
        xkv = xkv_ref[...]                            # [1, Tk, D] f32 encoder output
        Tk = xkv.shape[1]
        xkv2 = xkv.reshape(Tk, D).astype(MXU_DTYPE)
        q2d = jnp.dot(nq, wqkv[:, :HD], preferred_element_type=jnp.float32)
        kv = jnp.dot(xkv2, wqkv[:, HD:], preferred_element_type=jnp.float32)
        k2d, v2d = kv[:, :HD], kv[:, HD:]

    # head split via major-axis stack (lane slices are static), cast once to bf16
    def heads(a2d):
        return jnp.stack([a2d[:, h * DK:(h + 1) * DK] for h in range(H)],
                         axis=0).astype(MXU_DTYPE)    # [H, T, DK]
    qh, kh, vh = heads(q2d), heads(k2d), heads(v2d)

    # T5 attention: NO 1/sqrt(d_kv) scaling.  All heads in ONE batched einsum.
    s = jnp.einsum('hqd,hkd->hqk', qh, kh,
                   preferred_element_type=jnp.float32)                   # [H,Tq,Tk] f32

    # additive masks, all in f32 (mask fidelity)
    amask = amask_ref[...].astype(jnp.float32)        # [1, 1, Tk]
    s = s + (1.0 - amask) * NEG_INF
    if has_pbias:
        s = s + pbias_ref[...].astype(jnp.float32)    # [H, Tq, Tk]
    if causal:
        r = jax.lax.broadcasted_iota(jnp.int32, (Tq, Tk), 0)
        c = jax.lax.broadcasted_iota(jnp.int32, (Tq, Tk), 1)
        s = s + jnp.where(c <= r, 0.0, NEG_INF)[None, :, :]

    m = jnp.max(s, axis=-1, keepdims=True)
    e = jnp.exp(s - m)
    p = (e * pl.reciprocal(jnp.sum(e, axis=-1, keepdims=True),
                           approx=True)).astype(MXU_DTYPE)

    ctx = jnp.einsum('hqk,hkd->hqd', p, vh,
                     preferred_element_type=jnp.float32)                 # [H,Tq,DK] f32

    # merge heads (lane concat) -> single full-contraction output projection
    ctx2 = jnp.concatenate([ctx[h] for h in range(H)], axis=-1)          # [Tq, H*DK]
    out = jnp.dot(ctx2.astype(MXU_DTYPE), wo_ref[...],
                  preferred_element_type=jnp.float32)                    # [Tq, D]

    o_ref[...] = (x2 + out).reshape(1, Tq, D)         # fused residual add


def pallas_attention_block(x_q, x_kv, lnw, wqkv, wo, pbias, amask,
                           *, H, DK, self_attn, causal, has_pbias):
    B, Tq, D = x_q.shape
    HD = H * DK
    Tk = Tq if self_attn else x_kv.shape[1]

    wqkv_bf = wqkv.astype(MXU_DTYPE)
    wo_bf = wo.astype(MXU_DTYPE)
    amask3 = amask.reshape(B, 1, Tk).astype(jnp.float32)

    inputs = [x_q]
    in_specs = [pl.BlockSpec((1, Tq, D), lambda b: (b, 0, 0))]
    if not self_attn:
        inputs.append(x_kv)
        in_specs.append(pl.BlockSpec((1, Tk, D), lambda b: (b, 0, 0)))
    inputs += [lnw, wqkv_bf, wo_bf]
    in_specs += [pl.BlockSpec((1, D), lambda b: (0, 0)),
                 pl.BlockSpec((D, 3 * HD), lambda b: (0, 0)),       # resident weights
                 pl.BlockSpec((HD, D), lambda b: (0, 0))]
    if has_pbias:
        inputs.append(pbias.astype(MXU_DTYPE))
        in_specs.append(pl.BlockSpec((H, Tq, Tk), lambda b: (0, 0, 0)))
    inputs.append(amask3)
    in_specs.append(pl.BlockSpec((1, 1, Tk), lambda b: (b, 0, 0)))

    kern = functools.partial(_attn_block_kernel, H=H, DK=DK, self_attn=self_attn,
                             causal=causal, has_pbias=has_pbias)
    return pl.pallas_call(
        kern,
        out_shape=jax.ShapeDtypeStruct((B, Tq, D), jnp.float32),
        grid=(B,),                                    # pipelined + megacore over batch
        in_specs=in_specs,
        out_specs=pl.BlockSpec((1, Tq, D), lambda b: (b, 0, 0)),
        compiler_params=pltpu.CompilerParams(dimension_semantics=("parallel",)),
    )(*inputs)


# ---------------------------------------------------------------------------
# Kernel 2: fused FFN block, gridded over M = B*T rows ("parallel")
#   out = x + relu(RMSNorm(x) @ wi) @ wo   (+ optional final LayerNorm epilogue)
# ---------------------------------------------------------------------------

def _ffn_block_kernel(x_ref, lnw_ref, wi_ref, wo_ref, flnw_ref, o_ref, *, final_ln):
    x = x_ref[...]                                    # [mt, D] f32
    normed = _rmsnorm(x, lnw_ref[...]).astype(MXU_DTYPE)
    h = jnp.maximum(jnp.dot(normed, wi_ref[...],
                            preferred_element_type=jnp.float32), 0.0)    # ReLU
    y = x + jnp.dot(h.astype(MXU_DTYPE), wo_ref[...],
                    preferred_element_type=jnp.float32)                  # residual add
    if final_ln:                                      # encoder final_layer_norm epilogue
        y = _rmsnorm(y, flnw_ref[...])
    o_ref[...] = y


def pallas_ffn_block(x2d, lnw, wi, wo, flnw, *, final_ln, m_tile=512):
    M, D = x2d.shape
    DFF = wi.shape[1]
    mt = _pick_tile(M, m_tile)                        # bounds VMEM at real sizes
    return pl.pallas_call(
        functools.partial(_ffn_block_kernel, final_ln=final_ln),
        out_shape=jax.ShapeDtypeStruct((M, D), jnp.float32),
        grid=(M // mt,),
        in_specs=[pl.BlockSpec((mt, D), lambda i: (i, 0)),
                  pl.BlockSpec((1, D), lambda i: (0, 0)),
                  pl.BlockSpec((D, DFF), lambda i: (0, 0)),          # resident weights
                  pl.BlockSpec((DFF, D), lambda i: (0, 0)),
                  pl.BlockSpec((1, D), lambda i: (0, 0))],
        out_specs=pl.BlockSpec((mt, D), lambda i: (i, 0)),
        compiler_params=pltpu.CompilerParams(dimension_semantics=("parallel",)),
    )(x2d, lnw, wi.astype(MXU_DTYPE), wo.astype(MXU_DTYPE), flnw)


# ---------------------------------------------------------------------------
# Kernel 3: fused final LayerNorm + tied LM head + cross-entropy
#   Grid = (M tiles "parallel", vocab tiles "arbitrary") with online max / LSE /
#   target-logit accumulation: the [N, V] logits matrix never hits HBM.
# ---------------------------------------------------------------------------

def _lmhead_ce_kernel(y_ref, lnw_ref, emb_ref, labels_ref, nll_ref,
                      n_sc, m_sc, l_sc, t_sc, *, scale, v_tile):
    v = pl.program_id(1)

    @pl.when(v == 0)
    def _():
        # RMSNorm + tie_word_embeddings rescale hoisted: computed once per row tile
        n_sc[...] = (_rmsnorm(y_ref[...], lnw_ref[...]) * scale).astype(MXU_DTYPE)
        m_sc[...] = jnp.full(m_sc.shape, -1e30, jnp.float32)
        l_sc[...] = jnp.zeros(l_sc.shape, jnp.float32)
        t_sc[...] = jnp.zeros(t_sc.shape, jnp.float32)

    # logits_tile = normed @ emb_tile.T  (no materialized embedding transpose)
    logits = jax.lax.dot_general(n_sc[...], emb_ref[...],
                                 (((1,), (1,)), ((), ())),
                                 preferred_element_type=jnp.float32)     # [mt, v_tile]

    labels = labels_ref[...]                          # [mt, 1] int32
    col = jax.lax.broadcasted_iota(jnp.int32, logits.shape, 1) + v * v_tile
    onehot = (col == labels).astype(jnp.float32)
    t_sc[...] = t_sc[...] + jnp.sum(logits * onehot, axis=-1, keepdims=True)

    tile_max = jnp.max(logits, axis=-1, keepdims=True)
    m_new = jnp.maximum(m_sc[...], tile_max)
    l_sc[...] = (l_sc[...] * jnp.exp(m_sc[...] - m_new)
                 + jnp.sum(jnp.exp(logits - m_new), axis=-1, keepdims=True))
    m_sc[...] = m_new

    @pl.when(v == pl.num_programs(1) - 1)
    def _():
        valid = (labels != -100).astype(jnp.float32)  # ignore_index = -100
        lse = m_sc[...] + jnp.log(l_sc[...])
        nll_ref[...] = (lse - t_sc[...]) * valid      # per-row masked NLL


def pallas_lmhead_ce(y2d, flnw, emb, labels_flat, *, d_model,
                     m_tile=512, v_tile_pref=2048):
    M, D = y2d.shape
    V = emb.shape[0]
    mt = _pick_tile(M, m_tile)
    vt = _pick_tile(V, v_tile_pref)                   # keeps logits tile VMEM-bounded
    nm, nv = M // mt, V // vt
    labels2d = labels_flat.reshape(M, 1).astype(jnp.int32)
    scale = float(d_model) ** -0.5

    # TODO(synk): pipeline_mode=pl.Buffered(3) on the emb stream (v6e, 128 MiB VMEM).
    nll = pl.pallas_call(
        functools.partial(_lmhead_ce_kernel, scale=scale, v_tile=vt),
        out_shape=jax.ShapeDtypeStruct((M, 1), jnp.float32),
        grid=(nm, nv),
        in_specs=[pl.BlockSpec((mt, D), lambda m, v: (m, 0)),
                  pl.BlockSpec((1, D), lambda m, v: (0, 0)),
                  pl.BlockSpec((vt, D), lambda m, v: (v, 0)),    # bf16 vocab stream
                  pl.BlockSpec((mt, 1), lambda m, v: (m, 0))],
        out_specs=pl.BlockSpec((mt, 1), lambda m, v: (m, 0)),
        scratch_shapes=[pltpu.VMEM((mt, D), MXU_DTYPE),          # hoisted normed rows
                        pltpu.VMEM((mt, 1), jnp.float32),        # running max
                        pltpu.VMEM((mt, 1), jnp.float32),        # running sum-exp
                        pltpu.VMEM((mt, 1), jnp.float32)],       # target logit
        compiler_params=pltpu.CompilerParams(
            dimension_semantics=("parallel", "arbitrary")),
    )(y2d, flnw, emb.astype(MXU_DTYPE), labels2d)

    valid = (labels_flat != -100).astype(jnp.float32)
    # mean over valid tokens; all-ignored batch -> 0 (PyTorch would give NaN)
    return jnp.sum(nll[:, 0]) / jnp.maximum(jnp.sum(valid), 1.0)


# ---------------------------------------------------------------------------
# T5 glue (embedding lookup, relative-position buckets) in plain JAX
# ---------------------------------------------------------------------------

def _relative_position_bucket(relative_position, bidirectional, num_buckets=32,
                              max_distance=128):
    relative_buckets = jnp.zeros_like(relative_position)
    if bidirectional:
        num_buckets //= 2
        relative_buckets = relative_buckets + (relative_position > 0).astype(jnp.int32) * num_buckets
        relative_position = jnp.abs(relative_position)
    else:
        relative_position = -jnp.minimum(relative_position, 0)
    max_exact = num_buckets // 2
    is_small = relative_position < max_exact
    rp_f = jnp.maximum(relative_position, 1).astype(jnp.float32)
    rel_if_large = max_exact + (
        jnp.log(rp_f / max_exact) / math.log(max_distance / max_exact)
        * (num_buckets - max_exact)
    ).astype(jnp.int32)
    rel_if_large = jnp.minimum(rel_if_large, num_buckets - 1)
    return relative_buckets + jnp.where(is_small, relative_position, rel_if_large)


def compute_position_bias(rel_bias_table, Tq, Tk, bidirectional, num_buckets):
    ctx = jnp.arange(Tq)[:, None]
    mem = jnp.arange(Tk)[None, :]
    buckets = _relative_position_bucket(mem - ctx, bidirectional, num_buckets, 128)
    bias = rel_bias_table[buckets]                    # [Tq, Tk, H]
    return jnp.transpose(bias, (2, 0, 1))             # [H, Tq, Tk]


def init_params(key, V, D, H, DK, DFF, NB):
    keys = iter(jax.random.split(key, 32))

    def w(shape, scale=0.02):
        return (scale * jax.random.normal(next(keys), shape)).astype(jnp.float32)

    ones = lambda: jnp.ones((1, D), jnp.float32)
    HD = H * DK
    return {
        "shared": w((V, D)),
        "enc": {
            "ln1": ones(), "qkv": w((D, 3 * HD)), "o": w((HD, D)),
            "rel_bias": w((NB, H)),
            "ln2": ones(), "wi": w((D, DFF)), "wo": w((DFF, D)), "final_ln": ones(),
        },
        "dec": {
            "ln1": ones(), "sqkv": w((D, 3 * HD)), "so": w((HD, D)),
            "rel_bias": w((NB, H)),
            "ln2": ones(), "cqkv": w((D, 3 * HD)), "co": w((HD, D)),
            "ln3": ones(), "wi": w((D, DFF)), "wo": w((DFF, D)), "final_ln": ones(),
        },
    }


def t5gen_forward(params, input_ids, attention_mask, labels, H=2, DK=16, NB=32):
    """Mirrors T5Gen_Model.forward: mask pad labels to -100, run T5, return loss."""
    B, TS = input_ids.shape
    TT = labels.shape[1]
    D = params["shared"].shape[1]

    # --- the wrapper's own line: labels[labels == pad_token_id] = -100 ---
    labels = jnp.where(labels == PAD_ID, -100, labels)

    # --- T5._shift_right(labels) -> decoder_input_ids ---
    dec_in = jnp.concatenate(
        [jnp.full((B, 1), PAD_ID, labels.dtype), labels[:, :-1]], axis=1)
    dec_in = jnp.where(dec_in == -100, PAD_ID, dec_in)

    # --- masks / position biases (tiny glue; heavy lifting happens in-kernel) ---
    enc_amask = attention_mask.astype(jnp.float32)                     # [B, TS]
    dec_amask = jnp.ones((B, TT), jnp.float32)                         # causal handled in-kernel
    enc_pbias = compute_position_bias(params["enc"]["rel_bias"], TS, TS, True, NB)
    dec_pbias = compute_position_bias(params["dec"]["rel_bias"], TT, TT, False, NB)

    # ---------------- encoder (2 fused kernels) ----------------
    p = params["enc"]
    # TODO(synk): embedding gather left to XLA; a scalar-prefetch pl.Element row
    # gather kernel would also fold this in for the launch-bound toy regime.
    x = params["shared"][input_ids]                                    # [B, TS, D]
    x = pallas_attention_block(x, None, p["ln1"], p["qkv"], p["o"], enc_pbias, enc_amask,
                               H=H, DK=DK, self_attn=True, causal=False, has_pbias=True)
    enc_out = pallas_ffn_block(x.reshape(B * TS, D), p["ln2"], p["wi"], p["wo"],
                               p["final_ln"], final_ln=True).reshape(B, TS, D)

    # ---------------- decoder (3 fused kernels) ----------------
    p = params["dec"]
    y = params["shared"][dec_in]                                       # [B, TT, D]
    y = pallas_attention_block(y, None, p["ln1"], p["sqkv"], p["so"], dec_pbias, dec_amask,
                               H=H, DK=DK, self_attn=True, causal=True, has_pbias=True)
    # cross-attention: no relative-position bias (skip the all-zeros stream entirely)
    y = pallas_attention_block(y, enc_out, p["ln2"], p["cqkv"], p["co"], None, enc_amask,
                               H=H, DK=DK, self_attn=False, causal=False, has_pbias=False)
    y = pallas_ffn_block(y.reshape(B * TT, D), p["ln3"], p["wi"], p["wo"],
                         p["final_ln"], final_ln=False)                # [B*TT, D]

    # ---------------- final LN + tied LM head + loss (1 fused kernel) ----------------
    return pallas_lmhead_ce(y, p["final_ln"], params["shared"], labels.reshape(-1),
                            d_model=D)


# ---------------------------------------------------------------------------

if __name__ == "__main__":
    key = jax.random.PRNGKey(0)
    kp, ki, kl = jax.random.split(key, 3)

    B, TS, TT = 2, 8, 8
    V, D, H, DK, DFF, NB = 128, 32, 2, 16, 64, 32

    params = init_params(kp, V, D, H, DK, DFF, NB)

    input_ids = jax.random.randint(ki, (B, TS), 1, V, dtype=jnp.int32)
    attention_mask = jnp.ones((B, TS), jnp.int32)
    labels = jax.random.randint(kl, (B, TT), 0, V, dtype=jnp.int32)
    labels = labels.at[:, -1].set(PAD_ID)   # exercise the pad->-100 path

    fwd = jax.jit(functools.partial(t5gen_forward, H=H, DK=DK, NB=NB))
    loss = fwd(params, input_ids, attention_mask, labels)
    loss = jax.block_until_ready(loss)
    assert loss.shape == () and jnp.isfinite(loss)
    print("KERNEL_OK")
</pallas_src>

<mosaic_0001>
module attributes {stable_mosaic.version = 11 : i64} {
  func.func @_attn_block_kernel(%arg0: i32, %arg1: memref<1x8x32xf32, #tpu.memory_space<vmem>>, %arg2: memref<1x32xf32, #tpu.memory_space<vmem>>, %arg3: memref<32x96xbf16, #tpu.memory_space<vmem>>, %arg4: memref<32x32xbf16, #tpu.memory_space<vmem>>, %arg5: memref<2x8x8xbf16, #tpu.memory_space<vmem>>, %arg6: memref<1x1x8xf32, #tpu.memory_space<vmem>>, %arg7: memref<1x8x32xf32, #tpu.memory_space<vmem>>) attributes {dimension_semantics = [#tpu.dimension_semantics<parallel>], iteration_bounds = array<i64: 2>, scalar_prefetch = 0 : i64, scratch_operands = 0 : i64, tpu.core_type = #tpu.core_type<tc>, window_params = [{transform_indices = @transform_0, window_bounds = array<i64: 1, 8, 32>}, {pipeline_mode = #tpu.pipeline_mode<synchronous>, transform_indices = @transform_1, window_bounds = array<i64: 1, 32>}, {pipeline_mode = #tpu.pipeline_mode<synchronous>, transform_indices = @transform_2, window_bounds = array<i64: 32, 96>}, {pipeline_mode = #tpu.pipeline_mode<synchronous>, transform_indices = @transform_3, window_bounds = array<i64: 32, 32>}, {pipeline_mode = #tpu.pipeline_mode<synchronous>, transform_indices = @transform_4, window_bounds = array<i64: 2, 8, 8>}, {transform_indices = @transform_5, window_bounds = array<i64: 1, 1, 8>}, {transform_indices = @transform_6, window_bounds = array<i64: 1, 8, 32>}]} {
    %c0 = arith.constant 0 : index
    %c0_0 = arith.constant 0 : index
    %c0_1 = arith.constant 0 : index
    %0 = vector.load %arg1[%c0, %c0_0, %c0_1] : memref<1x8x32xf32, #tpu.memory_space<vmem>>, vector<1x8x32xf32>
    %1 = vector.shape_cast %0 : vector<1x8x32xf32> to vector<8x32xf32>
    %c0_2 = arith.constant 0 : index
    %c0_3 = arith.constant 0 : index
    %2 = vector.load %arg2[%c0_2, %c0_3] : memref<1x32xf32, #tpu.memory_space<vmem>>, vector<1x32xf32>
    %3 = arith.mulf %1, %1 : vector<8x32xf32>
    %cst = arith.constant dense<0.000000e+00> : vector<8xf32>
    %4 = vector.multi_reduction <add>, %3, %cst [1] : vector<8x32xf32> to vector<8xf32>
    %5 = vector.shape_cast %4 : vector<8xf32> to vector<8x1xf32>
    %cst_4 = arith.constant 3.200000e+01 : f32
    %6 = vector.broadcast %cst_4 : f32 to vector<8x1xf32>
    %7 = arith.divf %5, %6 : vector<8x1xf32>
    %cst_5 = arith.constant 9.99999997E-7 : f32
    %8 = vector.broadcast %cst_5 : f32 to vector<8x1xf32>
    %9 = arith.addf %7, %8 : vector<8x1xf32>
    %10 = math.rsqrt %9 : vector<8x1xf32>
    %11 = vector.broadcast %10 : vector<8x1xf32> to vector<8x32xf32>
    %12 = arith.mulf %1, %11 : vector<8x32xf32>
    %13 = vector.broadcast %2 : vector<1x32xf32> to vector<8x32xf32>
    %14 = arith.mulf %12, %13 : vector<8x32xf32>
    %15 = arith.truncf %14 : vector<8x32xf32> to vector<8x32xbf16>
    %c0_6 = arith.constant 0 : index
    %c0_7 = arith.constant 0 : index
    %16 = vector.load %arg3[%c0_6, %c0_7] : memref<32x96xbf16, #tpu.memory_space<vmem>>, vector<32x96xbf16>
    %cst_8 = arith.constant dense<0.000000e+00> : vector<8x96xf32>
    %17 = tpu.matmul %15, %16, %cst_8 {dimension_numbers = #tpu.dot_dimension_numbers<[1], [0], [0], [1], [0, 0, 1, 1], [], []>} : vector<8x32xbf16>, vector<32x96xbf16>, vector<8x96xf32> -> vector<8x96xf32>
    %18 = vector.extract_strided_slice %17 {offsets = [0, 0], sizes = [8, 32], strides = [1, 1]} : vector<8x96xf32> to vector<8x32xf32>
    %19 = vector.extract_strided_slice %17 {offsets = [0, 32], sizes = [8, 32], strides = [1, 1]} : vector<8x96xf32> to vector<8x32xf32>
    %20 = vector.extract_strided_slice %17 {offsets = [0, 64], sizes = [8, 32], strides = [1, 1]} : vector<8x96xf32> to vector<8x32xf32>
    %21 = vector.extract_strided_slice %18 {offsets = [0, 0], sizes = [8, 16], strides = [1, 1]} : vector<8x32xf32> to vector<8x16xf32>
    %22 = vector.extract_strided_slice %18 {offsets = [0, 16], sizes = [8, 16], strides = [1, 1]} : vector<8x32xf32> to vector<8x16xf32>
    %23 = vector.shape_cast %21 : vector<8x16xf32> to vector<1x8x16xf32>
    %24 = vector.shape_cast %22 : vector<8x16xf32> to vector<1x8x16xf32>
    %25 = tpu.concatenate %23, %24 in 0 : vector<1x8x16xf32>, vector<1x8x16xf32> -> vector<2x8x16xf32>
    %26 = arith.truncf %25 : vector<2x8x16xf32> to vector<2x8x16xbf16>
    %27 = vector.extract_strided_slice %19 {offsets = [0, 0], sizes = [8, 16], strides = [1, 1]} : vector<8x32xf32> to vector<8x16xf32>
    %28 = vector.extract_strided_slice %19 {offsets = [0, 16], sizes = [8, 16], strides = [1, 1]} : vector<8x32xf32> to vector<8x16xf32>
    %29 = vector.shape_cast %27 : vector<8x16xf32> to vector<1x8x16xf32>
    %30 = vector.shape_cast %28 : vector<8x16xf32> to vector<1x8x16xf32>
    %31 = tpu.concatenate %29, %30 in 0 : vector<1x8x16xf32>, vector<1x8x16xf32> -> vector<2x8x16xf32>
    %32 = arith.truncf %31 : vector<2x8x16xf32> to vector<2x8x16xbf16>
    %33 = vector.extract_strided_slice %20 {offsets = [0, 0], sizes = [8, 16], strides = [1, 1]} : vector<8x32xf32> to vector<8x16xf32>
    %34 = vector.extract_strided_slice %20 {offsets = [0, 16], sizes = [8, 16], strides = [1, 1]} : vector<8x32xf32> to vector<8x16xf32>
    %35 = vector.shape_cast %33 : vector<8x16xf32> to vector<1x8x16xf32>
    %36 = vector.shape_cast %34 : vector<8x16xf32> to vector<1x8x16xf32>
    %37 = tpu.concatenate %35, %36 in 0 : vector<1x8x16xf32>, vector<1x8x16xf32> -> vector<2x8x16xf32>
    %38 = arith.truncf %37 : vector<2x8x16xf32> to vector<2x8x16xbf16>
    "tpu.trace_start"() <{level = 10 : i32, message = "hqd,hkd->hqk"}> : () -> ()
    %cst_9 = arith.constant dense<0.000000e+00> : vector<2x8x8xf32>
    %39 = tpu.matmul %26, %32, %cst_9 {dimension_numbers = #tpu.dot_dimension_numbers<[2], [2], [1], [1], [0, 0, 0, 1, 1, 1], [0], [0]>} : vector<2x8x16xbf16>, vector<2x8x16xbf16>, vector<2x8x8xf32> -> vector<2x8x8xf32>
    "tpu.trace_stop"() : () -> ()
    %c0_10 = arith.constant 0 : index
    %c0_11 = arith.constant 0 : index
    %c0_12 = arith.constant 0 : index
    %40 = vector.load %arg6[%c0_10, %c0_11, %c0_12] : memref<1x1x8xf32, #tpu.memory_space<vmem>>, vector<1x1x8xf32>
    %cst_13 = arith.constant 1.000000e+00 : f32
    %41 = vector.broadcast %cst_13 : f32 to vector<1x1x8xf32>
    %42 = arith.subf %41, %40 : vector<1x1x8xf32>
    %cst_14 = arith.constant -1.000000e+09 : f32
    %43 = vector.broadcast %cst_14 : f32 to vector<1x1x8xf32>
    %44 = arith.mulf %42, %43 : vector<1x1x8xf32>
    %45 = vector.broadcast %44 : vector<1x1x8xf32> to vector<2x8x8xf32>
    %46 = arith.addf %39, %45 : vector<2x8x8xf32>
    %c0_15 = arith.constant 0 : index
    %c0_16 = arith.constant 0 : index
    %c0_17 = arith.constant 0 : index
    %47 = vector.load %arg5[%c0_15, %c0_16, %c0_17] : memref<2x8x8xbf16, #tpu.memory_space<vmem>>, vector<2x8x8xbf16>
    %48 = arith.extf %47 : vector<2x8x8xbf16> to vector<2x8x8xf32>
    %49 = arith.addf %46, %48 : vector<2x8x8xf32>
    %cst_18 = arith.constant dense<0xFF800000> : vector<2x8xf32>
    %50 = vector.multi_reduction <maximumf>, %49, %cst_18 [2] : vector<2x8x8xf32> to vector<2x8xf32>
    %51 = vector.shape_cast %50 : vector<2x8xf32> to vector<2x8x1xf32>
    %52 = vector.broadcast %51 : vector<2x8x1xf32> to vector<2x8x8xf32>
    %53 = arith.subf %49, %52 : vector<2x8x8xf32>
    %54 = math.exp %53 : vector<2x8x8xf32>
    %cst_19 = arith.constant dense<0.000000e+00> : vector<2x8xf32>
    %55 = vector.multi_reduction <add>, %54, %cst_19 [2] : vector<2x8x8xf32> to vector<2x8xf32>
    %56 = vector.shape_cast %55 : vector<2x8xf32> to vector<2x8x1xf32>
    %57 = tpu.reciprocal %56 {approx = true} : vector<2x8x1xf32> -> vector<2x8x1xf32>
    %58 = vector.broadcast %57 : vector<2x8x1xf32> to vector<2x8x8xf32>
    %59 = arith.mulf %54, %58 : vector<2x8x8xf32>
    %60 = arith.truncf %59 : vector<2x8x8xf32> to vector<2x8x8xbf16>
    "tpu.trace_start"() <{level = 10 : i32, message = "hqk,hkd->hqd"}> : () -> ()
    %cst_20 = arith.constant dense<0.000000e+00> : vector<2x8x16xf32>
    %61 = tpu.matmul %60, %38, %cst_20 {dimension_numbers = #tpu.dot_dimension_numbers<[2], [1], [1], [2], [0, 0, 0, 1, 1, 2], [0], [0]>} : vector<2x8x8xbf16>, vector<2x8x16xbf16>, vector<2x8x16xf32> -> vector<2x8x16xf32>
    "tpu.trace_stop"() : () -> ()
    %62 = vector.extract_strided_slice %61 {offsets = [0, 0, 0], sizes = [1, 8, 16], strides = [1, 1, 1]} : vector<2x8x16xf32> to vector<1x8x16xf32>
    %63 = vector.shape_cast %62 : vector<1x8x16xf32> to vector<8x16xf32>
    %64 = vector.extract_strided_slice %61 {offsets = [1, 0, 0], sizes = [1, 8, 16], strides = [1, 1, 1]} : vector<2x8x16xf32> to vector<1x8x16xf32>
    %65 = vector.shape_cast %64 : vector<1x8x16xf32> to vector<8x16xf32>
    %66 = tpu.concatenate %63, %65 in 1 : vector<8x16xf32>, vector<8x16xf32> -> vector<8x32xf32>
    %67 = arith.truncf %66 : vector<8x32xf32> to vector<8x32xbf16>
    %c0_21 = arith.constant 0 : index
    %c0_22 = arith.constant 0 : index
    %68 = vector.load %arg4[%c0_21, %c0_22] : memref<32x32xbf16, #tpu.memory_space<vmem>>, vector<32x32xbf16>
    %cst_23 = arith.constant dense<0.000000e+00> : vector<8x32xf32>
    %69 = tpu.matmul %67, %68, %cst_23 {dimension_numbers = #tpu.dot_dimension_numbers<[1], [0], [0], [1], [0, 0, 1, 1], [], []>} : vector<8x32xbf16>, vector<32x32xbf16>, vector<8x32xf32> -> vector<8x32xf32>
    %70 = arith.addf %1, %69 : vector<8x32xf32>
    %71 = vector.shape_cast %70 : vector<8x32xf32> to vector<1x8x32xf32>
    %c0_24 = arith.constant 0 : index
    %c0_25 = arith.constant 0 : index
    %c0_26 = arith.constant 0 : index
    %72 = vector.load %arg7[%c0_24, %c0_25, %c0_26] : memref<1x8x32xf32, #tpu.memory_space<vmem>>, vector<1x8x32xf32>
    tpu.vector_store %arg7[%c0_24, %c0_25, %c0_26], %71 {strides = array<i32>} : memref<1x8x32xf32, #tpu.memory_space<vmem>>, vector<1x8x32xf32>,
    return
  }
  func.func @transform_0(%arg0: i32) -> (i32, i32, i32) {
    %c0_i32 = arith.constant 0 : i32
    %c0_i32_0 = arith.constant 0 : i32
    %c0_i32_1 = arith.constant 0 : i32
    return %arg0, %c0_i32, %c0_i32_0 : i32, i32, i32
  }
  func.func @transform_1(%arg0: i32) -> (i32, i32) {
    %c0_i32 = arith.constant 0 : i32
    %c0_i32_0 = arith.constant 0 : i32
    %c0_i32_1 = arith.constant 0 : i32
    return %c0_i32, %c0_i32_0 : i32, i32
  }
  func.func @transform_2(%arg0: i32) -> (i32, i32) {
    %c0_i32 = arith.constant 0 : i32
    %c0_i32_0 = arith.constant 0 : i32
    %c0_i32_1 = arith.constant 0 : i32
    return %c0_i32, %c0_i32_0 : i32, i32
  }
  func.func @transform_3(%arg0: i32) -> (i32, i32) {
    %c0_i32 = arith.constant 0 : i32
    %c0_i32_0 = arith.constant 0 : i32
    %c0_i32_1 = arith.constant 0 : i32
    return %c0_i32, %c0_i32_0 : i32, i32
  }
  func.func @transform_4(%arg0: i32) -> (i32, i32, i32) {
    %c0_i32 = arith.constant 0 : i32
    %c0_i32_0 = arith.constant 0 : i32
    %c0_i32_1 = arith.constant 0 : i32
    %c0_i32_2 = arith.constant 0 : i32
    return %c0_i32, %c0_i32_0, %c0_i32_1 : i32, i32, i32
  }
  func.func @transform_5(%arg0: i32) -> (i32, i32, i32) {
    %c0_i32 = arith.constant 0 : i32
    %c0_i32_0 = arith.constant 0 : i32
    %c0_i32_1 = arith.constant 0 : i32
    return %arg0, %c0_i32, %c0_i32_0 : i32, i32, i32
  }
  func.func @transform_6(%arg0: i32) -> (i32, i32, i32) {
    %c0_i32 = arith.constant 0 : i32
    %c0_i32_0 = arith.constant 0 : i32
    %c0_i32_1 = arith.constant 0 : i32
    return %arg0, %c0_i32, %c0_i32_0 : i32, i32, i32
  }
}

module attributes {stable_mosaic.version = 11 : i64} {
  func.func @_ffn_block_kernel(%arg0: i32, %arg1: memref<16x32xf32, #tpu.memory_space<vmem>>, %arg2: memref<1x32xf32, #tpu.memory_space<vmem>>, %arg3: memref<32x64xbf16, #tpu.memory_space<vmem>>, %arg4: memref<64x32xbf16, #tpu.memory_space<vmem>>, %arg5: memref<1x32xf32, #tpu.memory_space<vmem>>, %arg6: memref<16x32xf32, #tpu.memory_space<vmem>>) attributes {dimension_semantics = [#tpu.dimension_semantics<parallel>], iteration_bounds = array<i64: 1>, scalar_prefetch = 0 : i64, scratch_operands = 0 : i64, tpu.core_type = #tpu.core_type<tc>, window_params = [{transform_indices = @transform_0, window_bounds = array<i64: 16, 32>}, {pipeline_mode = #tpu.pipeline_mode<synchronous>, transform_indices = @transform_1, window_bounds = array<i64: 1, 32>}, {pipeline_mode = #tpu.pipeline_mode<synchronous>, transform_indices = @transform_2, window_bounds = array<i64: 32, 64>}, {pipeline_mode = #tpu.pipeline_mode<synchronous>, transform_indices = @transform_3, window_bounds = array<i64: 64, 32>}, {pipeline_mode = #tpu.pipeline_mode<synchronous>, transform_indices = @transform_4, window_bounds = array<i64: 1, 32>}, {transform_indices = @transform_5, window_bounds = array<i64: 16, 32>}]} {
    %c0 = arith.constant 0 : index
    %c0_0 = arith.constant 0 : index
    %0 = vector.load %arg1[%c0, %c0_0] : memref<16x32xf32, #tpu.memory_space<vmem>>, vector<16x32xf32>
    %c0_1 = arith.constant 0 : index
    %c0_2 = arith.constant 0 : index
    %1 = vector.load %arg2[%c0_1, %c0_2] : memref<1x32xf32, #tpu.memory_space<vmem>>, vector<1x32xf32>
    %2 = arith.mulf %0, %0 : vector<16x32xf32>
    %cst = arith.constant dense<0.000000e+00> : vector<16xf32>
    %3 = vector.multi_reduction <add>, %2, %cst [1] : vector<16x32xf32> to vector<16xf32>
    %4 = vector.shape_cast %3 : vector<16xf32> to vector<16x1xf32>
    %cst_3 = arith.constant 3.200000e+01 : f32
    %5 = vector.broadcast %cst_3 : f32 to vector<16x1xf32>
    %6 = arith.divf %4, %5 : vector<16x1xf32>
    %cst_4 = arith.constant 9.99999997E-7 : f32
    %7 = vector.broadcast %cst_4 : f32 to vector<16x1xf32>
    %8 = arith.addf %6, %7 : vector<16x1xf32>
    %9 = math.rsqrt %8 : vector<16x1xf32>
    %10 = vector.broadcast %9 : vector<16x1xf32> to vector<16x32xf32>
    %11 = arith.mulf %0, %10 : vector<16x32xf32>
    %12 = vector.broadcast %1 : vector<1x32xf32> to vector<16x32xf32>
    %13 = arith.mulf %11, %12 : vector<16x32xf32>
    %14 = arith.truncf %13 : vector<16x32xf32> to vector<16x32xbf16>
    %c0_5 = arith.constant 0 : index
    %c0_6 = arith.constant 0 : index
    %15 = vector.load %arg3[%c0_5, %c0_6] : memref<32x64xbf16, #tpu.memory_space<vmem>>, vector<32x64xbf16>
    %cst_7 = arith.constant dense<0.000000e+00> : vector<16x64xf32>
    %16 = tpu.matmul %14, %15, %cst_7 {dimension_numbers = #tpu.dot_dimension_numbers<[1], [0], [0], [1], [0, 0, 1, 1], [], []>} : vector<16x32xbf16>, vector<32x64xbf16>, vector<16x64xf32> -> vector<16x64xf32>
    %cst_8 = arith.constant 0.000000e+00 : f32
    %17 = vector.broadcast %cst_8 : f32 to vector<16x64xf32>
    %18 = arith.maximumf %16, %17 : vector<16x64xf32>
    %19 = arith.truncf %18 : vector<16x64xf32> to vector<16x64xbf16>
    %c0_9 = arith.constant 0 : index
    %c0_10 = arith.constant 0 : index
    %20 = vector.load %arg4[%c0_9, %c0_10] : memref<64x32xbf16, #tpu.memory_space<vmem>>, vector<64x32xbf16>
    %cst_11 = arith.constant dense<0.000000e+00> : vector<16x32xf32>
    %21 = tpu.matmul %19, %20, %cst_11 {dimension_numbers = #tpu.dot_dimension_numbers<[1], [0], [0], [1], [0, 0, 1, 1], [], []>} : vector<16x64xbf16>, vector<64x32xbf16>, vector<16x32xf32> -> vector<16x32xf32>
    %22 = arith.addf %0, %21 : vector<16x32xf32>
    %c0_12 = arith.constant 0 : index
    %c0_13 = arith.constant 0 : index
    %23 = vector.load %arg5[%c0_12, %c0_13] : memref<1x32xf32, #tpu.memory_space<vmem>>, vector<1x32xf32>
    %24 = arith.mulf %22, %22 : vector<16x32xf32>
    %cst_14 = arith.constant dense<0.000000e+00> : vector<16xf32>
    %25 = vector.multi_reduction <add>, %24, %cst_14 [1] : vector<16x32xf32> to vector<16xf32>
    %26 = vector.shape_cast %25 : vector<16xf32> to vector<16x1xf32>
    %cst_15 = arith.constant 3.200000e+01 : f32
    %27 = vector.broadcast %cst_15 : f32 to vector<16x1xf32>
    %28 = arith.divf %26, %27 : vector<16x1xf32>
    %cst_16 = arith.constant 9.99999997E-7 : f32
    %29 = vector.broadcast %cst_16 : f32 to vector<16x1xf32>
    %30 = arith.addf %28, %29 : vector<16x1xf32>
    %31 = math.rsqrt %30 : vector<16x1xf32>
    %32 = vector.broadcast %31 : vector<16x1xf32> to vector<16x32xf32>
    %33 = arith.mulf %22, %32 : vector<16x32xf32>
    %34 = vector.broadcast %23 : vector<1x32xf32> to vector<16x32xf32>
    %35 = arith.mulf %33, %34 : vector<16x32xf32>
    %c0_17 = arith.constant 0 : index
    %c0_18 = arith.constant 0 : index
    %36 = vector.load %arg6[%c0_17, %c0_18] : memref<16x32xf32, #tpu.memory_space<vmem>>, vector<16x32xf32>
    tpu.vector_store %arg6[%c0_17, %c0_18], %35 {strides = array<i32>} : memref<16x32xf32, #tpu.memory_space<vmem>>, vector<16x32xf32>,
    return
  }
  func.func @transform_0(%arg0: i32) -> (i32, i32) {
    %c0_i32 = arith.constant 0 : i32
    %c0_i32_0 = arith.constant 0 : i32
    return %arg0, %c0_i32 : i32, i32
  }
  func.func @transform_1(%arg0: i32) -> (i32, i32) {
    %c0_i32 = arith.constant 0 : i32
    %c0_i32_0 = arith.constant 0 : i32
    %c0_i32_1 = arith.constant 0 : i32
    return %c0_i32, %c0_i32_0 : i32, i32
  }
  func.func @transform_2(%arg0: i32) -> (i32, i32) {
    %c0_i32 = arith.constant 0 : i32
    %c0_i32_0 = arith.constant 0 : i32
    %c0_i32_1 = arith.constant 0 : i32
    return %c0_i32, %c0_i32_0 : i32, i32
  }
  func.func @transform_3(%arg0: i32) -> (i32, i32) {
    %c0_i32 = arith.constant 0 : i32
    %c0_i32_0 = arith.constant 0 : i32
    %c0_i32_1 = arith.constant 0 : i32
    return %c0_i32, %c0_i32_0 : i32, i32
  }
  func.func @transform_4(%arg0: i32) -> (i32, i32) {
    %c0_i32 = arith.constant 0 : i32
    %c0_i32_0 = arith.constant 0 : i32
    %c0_i32_1 = arith.constant 0 : i32
    return %c0_i32, %c0_i32_0 : i32, i32
  }
  func.func @transform_5(%arg0: i32) -> (i32, i32) {
    %c0_i32 = arith.constant 0 : i32
    %c0_i32_0 = arith.constant 0 : i32
    return %arg0, %c0_i32 : i32, i32
  }
}

module attributes {stable_mosaic.version = 11 : i64} {
  func.func @_attn_block_kernel(%arg0: i32, %arg1: memref<1x8x32xf32, #tpu.memory_space<vmem>>, %arg2: memref<1x32xf32, #tpu.memory_space<vmem>>, %arg3: memref<32x96xbf16, #tpu.memory_space<vmem>>, %arg4: memref<32x32xbf16, #tpu.memory_space<vmem>>, %arg5: memref<2x8x8xbf16, #tpu.memory_space<vmem>>, %arg6: memref<1x1x8xf32, #tpu.memory_space<vmem>>, %arg7: memref<1x8x32xf32, #tpu.memory_space<vmem>>) attributes {dimension_semantics = [#tpu.dimension_semantics<parallel>], iteration_bounds = array<i64: 2>, scalar_prefetch = 0 : i64, scratch_operands = 0 : i64, tpu.core_type = #tpu.core_type<tc>, window_params = [{transform_indices = @transform_0, window_bounds = array<i64: 1, 8, 32>}, {pipeline_mode = #tpu.pipeline_mode<synchronous>, transform_indices = @transform_1, window_bounds = array<i64: 1, 32>}, {pipeline_mode = #tpu.pipeline_mode<synchronous>, transform_indices = @transform_2, window_bounds = array<i64: 32, 96>}, {pipeline_mode = #tpu.pipeline_mode<synchronous>, transform_indices = @transform_3, window_bounds = array<i64: 32, 32>}, {pipeline_mode = #tpu.pipeline_mode<synchronous>, transform_indices = @transform_4, window_bounds = array<i64: 2, 8, 8>}, {transform_indices = @transform_5, window_bounds = array<i64: 1, 1, 8>}, {transform_indices = @transform_6, window_bounds = array<i64: 1, 8, 32>}]} {
    %c0 = arith.constant 0 : index
    %c0_0 = arith.constant 0 : index
    %c0_1 = arith.constant 0 : index
    %0 = vector.load %arg1[%c0, %c0_0, %c0_1] : memref<1x8x32xf32, #tpu.memory_space<vmem>>, vector<1x8x32xf32>
    %1 = vector.shape_cast %0 : vector<1x8x32xf32> to vector<8x32xf32>
    %c0_2 = arith.constant 0 : index
    %c0_3 = arith.constant 0 : index
    %2 = vector.load %arg2[%c0_2, %c0_3] : memref<1x32xf32, #tpu.memory_space<vmem>>, vector<1x32xf32>
    %3 = arith.mulf %1, %1 : vector<8x32xf32>
    %cst = arith.constant dense<0.000000e+00> : vector<8xf32>
    %4 = vector.multi_reduction <add>, %3, %cst [1] : vector<8x32xf32> to vector<8xf32>
    %5 = vector.shape_cast %4 : vector<8xf32> to vector<8x1xf32>
    %cst_4 = arith.constant 3.200000e+01 : f32
    %6 = vector.broadcast %cst_4 : f32 to vector<8x1xf32>
    %7 = arith.divf %5, %6 : vector<8x1xf32>
    %cst_5 = arith.constant 9.99999997E-7 : f32
    %8 = vector.broadcast %cst_5 : f32 to vector<8x1xf32>
    %9 = arith.addf %7, %8 : vector<8x1xf32>
    %10 = math.rsqrt %9 : vector<8x1xf32>
    %11 = vector.broadcast %10 : vector<8x1xf32> to vector<8x32xf32>
    %12 = arith.mulf %1, %11 : vector<8x32xf32>
    %13 = vector.broadcast %2 : vector<1x32xf32> to vector<8x32xf32>
    %14 = arith.mulf %12, %13 : vector<8x32xf32>
    %15 = arith.truncf %14 : vector<8x32xf32> to vector<8x32xbf16>
    %c0_6 = arith.constant 0 : index
    %c0_7 = arith.constant 0 : index
    %16 = vector.load %arg3[%c0_6, %c0_7] : memref<32x96xbf16, #tpu.memory_space<vmem>>, vector<32x96xbf16>
    %cst_8 = arith.constant dense<0.000000e+00> : vector<8x96xf32>
    %17 = tpu.matmul %15, %16, %cst_8 {dimension_numbers = #tpu.dot_dimension_numbers<[1], [0], [0], [1], [0, 0, 1, 1], [], []>} : vector<8x32xbf16>, vector<32x96xbf16>, vector<8x96xf32> -> vector<8x96xf32>
    %18 = vector.extract_strided_slice %17 {offsets = [0, 0], sizes = [8, 32], strides = [1, 1]} : vector<8x96xf32> to vector<8x32xf32>
    %19 = vector.extract_strided_slice %17 {offsets = [0, 32], sizes = [8, 32], strides = [1, 1]} : vector<8x96xf32> to vector<8x32xf32>
    %20 = vector.extract_strided_slice %17 {offsets = [0, 64], sizes = [8, 32], strides = [1, 1]} : vector<8x96xf32> to vector<8x32xf32>
    %21 = vector.extract_strided_slice %18 {offsets = [0, 0], sizes = [8, 16], strides = [1, 1]} : vector<8x32xf32> to vector<8x16xf32>
    %22 = vector.extract_strided_slice %18 {offsets = [0, 16], sizes = [8, 16], strides = [1, 1]} : vector<8x32xf32> to vector<8x16xf32>
    %23 = vector.shape_cast %21 : vector<8x16xf32> to vector<1x8x16xf32>
    %24 = vector.shape_cast %22 : vector<8x16xf32> to vector<1x8x16xf32>
    %25 = tpu.concatenate %23, %24 in 0 : vector<1x8x16xf32>, vector<1x8x16xf32> -> vector<2x8x16xf32>
    %26 = arith.truncf %25 : vector<2x8x16xf32> to vector<2x8x16xbf16>
    %27 = vector.extract_strided_slice %19 {offsets = [0, 0], sizes = [8, 16], strides = [1, 1]} : vector<8x32xf32> to vector<8x16xf32>
    %28 = vector.extract_strided_slice %19 {offsets = [0, 16], sizes = [8, 16], strides = [1, 1]} : vector<8x32xf32> to vector<8x16xf32>
    %29 = vector.shape_cast %27 : vector<8x16xf32> to vector<1x8x16xf32>
    %30 = vector.shape_cast %28 : vector<8x16xf32> to vector<1x8x16xf32>
    %31 = tpu.concatenate %29, %30 in 0 : vector<1x8x16xf32>, vector<1x8x16xf32> -> vector<2x8x16xf32>
    %32 = arith.truncf %31 : vector<2x8x16xf32> to vector<2x8x16xbf16>
    %33 = vector.extract_strided_slice %20 {offsets = [0, 0], sizes = [8, 16], strides = [1, 1]} : vector<8x32xf32> to vector<8x16xf32>
    %34 = vector.extract_strided_slice %20 {offsets = [0, 16], sizes = [8, 16], strides = [1, 1]} : vector<8x32xf32> to vector<8x16xf32>
    %35 = vector.shape_cast %33 : vector<8x16xf32> to vector<1x8x16xf32>
    %36 = vector.shape_cast %34 : vector<8x16xf32> to vector<1x8x16xf32>
    %37 = tpu.concatenate %35, %36 in 0 : vector<1x8x16xf32>, vector<1x8x16xf32> -> vector<2x8x16xf32>
    %38 = arith.truncf %37 : vector<2x8x16xf32> to vector<2x8x16xbf16>
    "tpu.trace_start"() <{level = 10 : i32, message = "hqd,hkd->hqk"}> : () -> ()
    %cst_9 = arith.constant dense<0.000000e+00> : vector<2x8x8xf32>
    %39 = tpu.matmul %26, %32, %cst_9 {dimension_numbers = #tpu.dot_dimension_numbers<[2], [2], [1], [1], [0, 0, 0, 1, 1, 1], [0], [0]>} : vector<2x8x16xbf16>, vector<2x8x16xbf16>, vector<2x8x8xf32> -> vector<2x8x8xf32>
    "tpu.trace_stop"() : () -> ()
    %c0_10 = arith.constant 0 : index
    %c0_11 = arith.constant 0 : index
    %c0_12 = arith.constant 0 : index
    %40 = vector.load %arg6[%c0_10, %c0_11, %c0_12] : memref<1x1x8xf32, #tpu.memory_space<vmem>>, vector<1x1x8xf32>
    %cst_13 = arith.constant 1.000000e+00 : f32
    %41 = vector.broadcast %cst_13 : f32 to vector<1x1x8xf32>
    %42 = arith.subf %41, %40 : vector<1x1x8xf32>
    %cst_14 = arith.constant -1.000000e+09 : f32
    %43 = vector.broadcast %cst_14 : f32 to vector<1x1x8xf32>
    %44 = arith.mulf %42, %43 : vector<1x1x8xf32>
    %45 = vector.broadcast %44 : vector<1x1x8xf32> to vector<2x8x8xf32>
    %46 = arith.addf %39, %45 : vector<2x8x8xf32>
    %c0_15 = arith.constant 0 : index
    %c0_16 = arith.constant 0 : index
    %c0_17 = arith.constant 0 : index
    %47 = vector.load %arg5[%c0_15, %c0_16, %c0_17] : memref<2x8x8xbf16, #tpu.memory_space<vmem>>, vector<2x8x8xbf16>
    %48 = arith.extf %47 : vector<2x8x8xbf16> to vector<2x8x8xf32>
    %49 = arith.addf %46, %48 : vector<2x8x8xf32>
    %50 = tpu.iota {dimensions = array<i32: 0>} : vector<8x8xi32>
    %51 = tpu.iota {dimensions = array<i32: 1>} : vector<8x8xi32>
    %52 = arith.cmpi sle, %51, %50 : vector<8x8xi32>
    %cst_18 = arith.constant 0.000000e+00 : f32
    %cst_19 = arith.constant -1.000000e+09 : f32
    %53 = vector.broadcast %cst_18 : f32 to vector<8x8xf32>
    %54 = vector.broadcast %cst_19 : f32 to vector<8x8xf32>
    %55 = arith.select %52, %53, %54 : vector<8x8xi1>, vector<8x8xf32>
    %56 = vector.shape_cast %55 : vector<8x8xf32> to vector<1x8x8xf32>
    %57 = vector.broadcast %56 : vector<1x8x8xf32> to vector<2x8x8xf32>
    %58 = arith.addf %49, %57 : vector<2x8x8xf32>
    %cst_20 = arith.constant dense<0xFF800000> : vector<2x8xf32>
    %59 = vector.multi_reduction <maximumf>, %58, %cst_20 [2] : vector<2x8x8xf32> to vector<2x8xf32>
    %60 = vector.shape_cast %59 : vector<2x8xf32> to vector<2x8x1xf32>
    %61 = vector.broadcast %60 : vector<2x8x1xf32> to vector<2x8x8xf32>
    %62 = arith.subf %58, %61 : vector<2x8x8xf32>
    %63 = math.exp %62 : vector<2x8x8xf32>
    %cst_21 = arith.constant dense<0.000000e+00> : vector<2x8xf32>
    %64 = vector.multi_reduction <add>, %63, %cst_21 [2] : vector<2x8x8xf32> to vector<2x8xf32>
    %65 = vector.shape_cast %64 : vector<2x8xf32> to vector<2x8x1xf32>
    %66 = tpu.reciprocal %65 {approx = true} : vector<2x8x1xf32> -> vector<2x8x1xf32>
    %67 = vector.broadcast %66 : vector<2x8x1xf32> to vector<2x8x8xf32>
    %68 = arith.mulf %63, %67 : vector<2x8x8xf32>
    %69 = arith.truncf %68 : vector<2x8x8xf32> to vector<2x8x8xbf16>
    "tpu.trace_start"() <{level = 10 : i32, message = "hqk,hkd->hqd"}> : () -> ()
    %cst_22 = arith.constant dense<0.000000e+00> : vector<2x8x16xf32>
    %70 = tpu.matmul %69, %38, %cst_22 {dimension_numbers = #tpu.dot_dimension_numbers<[2], [1], [1], [2], [0, 0, 0, 1, 1, 2], [0], [0]>} : vector<2x8x8xbf16>, vector<2x8x16xbf16>, vector<2x8x16xf32> -> vector<2x8x16xf32>
    "tpu.trace_stop"() : () -> ()
    %71 = vector.extract_strided_slice %70 {offsets = [0, 0, 0], sizes = [1, 8, 16], strides = [1, 1, 1]} : vector<2x8x16xf32> to vector<1x8x16xf32>
    %72 = vector.shape_cast %71 : vector<1x8x16xf32> to vector<8x16xf32>
    %73 = vector.extract_strided_slice %70 {offsets = [1, 0, 0], sizes = [1, 8, 16], strides = [1, 1, 1]} : vector<2x8x16xf32> to vector<1x8x16xf32>
    %74 = vector.shape_cast %73 : vector<1x8x16xf32> to vector<8x16xf32>
    %75 = tpu.concatenate %72, %74 in 1 : vector<8x16xf32>, vector<8x16xf32> -> vector<8x32xf32>
    %76 = arith.truncf %75 : vector<8x32xf32> to vector<8x32xbf16>
    %c0_23 = arith.constant 0 : index
    %c0_24 = arith.constant 0 : index
    %77 = vector.load %arg4[%c0_23, %c0_24] : memref<32x32xbf16, #tpu.memory_space<vmem>>, vector<32x32xbf16>
    %cst_25 = arith.constant dense<0.000000e+00> : vector<8x32xf32>
    %78 = tpu.matmul %76, %77, %cst_25 {dimension_numbers = #tpu.dot_dimension_numbers<[1], [0], [0], [1], [0, 0, 1, 1], [], []>} : vector<8x32xbf16>, vector<32x32xbf16>, vector<8x32xf32> -> vector<8x32xf32>
    %79 = arith.addf %1, %78 : vector<8x32xf32>
    %80 = vector.shape_cast %79 : vector<8x32xf32> to vector<1x8x32xf32>
    %c0_26 = arith.constant 0 : index
    %c0_27 = arith.constant 0 : index
    %c0_28 = arith.constant 0 : index
    %81 = vector.load %arg7[%c0_26, %c0_27, %c0_28] : memref<1x8x32xf32, #tpu.memory_space<vmem>>, vector<1x8x32xf32>
    tpu.vector_store %arg7[%c0_26, %c0_27, %c0_28], %80 {strides = array<i32>} : memref<1x8x32xf32, #tpu.memory_space<vmem>>, vector<1x8x32xf32>,
    return
  }
  func.func @transform_0(%arg0: i32) -> (i32, i32, i32) {
    %c0_i32 = arith.constant 0 : i32
    %c0_i32_0 = arith.constant 0 : i32
    %c0_i32_1 = arith.constant 0 : i32
    return %arg0, %c0_i32, %c0_i32_0 : i32, i32, i32
  }
  func.func @transform_1(%arg0: i32) -> (i32, i32) {
    %c0_i32 = arith.constant 0 : i32
    %c0_i32_0 = arith.constant 0 : i32
    %c0_i32_1 = arith.constant 0 : i32
    return %c0_i32, %c0_i32_0 : i32, i32
  }
  func.func @transform_2(%arg0: i32) -> (i32, i32) {
    %c0_i32 = arith.constant 0 : i32
    %c0_i32_0 = arith.constant 0 : i32
    %c0_i32_1 = arith.constant 0 : i32
    return %c0_i32, %c0_i32_0 : i32, i32
  }
  func.func @transform_3(%arg0: i32) -> (i32, i32) {
    %c0_i32 = arith.constant 0 : i32
    %c0_i32_0 = arith.constant 0 : i32
    %c0_i32_1 = arith.constant 0 : i32
    return %c0_i32, %c0_i32_0 : i32, i32
  }
  func.func @transform_4(%arg0: i32) -> (i32, i32, i32) {
    %c0_i32 = arith.constant 0 : i32
    %c0_i32_0 = arith.constant 0 : i32
    %c0_i32_1 = arith.constant 0 : i32
    %c0_i32_2 = arith.constant 0 : i32
    return %c0_i32, %c0_i32_0, %c0_i32_1 : i32, i32, i32
  }
  func.func @transform_5(%arg0: i32) -> (i32, i32, i32) {
    %c0_i32 = arith.constant 0 : i32
    %c0_i32_0 = arith.constant 0 : i32
    %c0_i32_1 = arith.constant 0 : i32
    return %arg0, %c0_i32, %c0_i32_0 : i32, i32, i32
  }
  func.func @transform_6(%arg0: i32) -> (i32, i32, i32) {
    %c0_i32 = arith.constant 0 : i32
    %c0_i32_0 = arith.constant 0 : i32
    %c0_i32_1 = arith.constant 0 : i32
    return %arg0, %c0_i32, %c0_i32_0 : i32, i32, i32
  }
}

module attributes {stable_mosaic.version = 11 : i64} {
  func.func @_attn_block_kernel(%arg0: i32, %arg1: memref<1x8x32xf32, #tpu.memory_space<vmem>>, %arg2: memref<1x8x32xf32, #tpu.memory_space<vmem>>, %arg3: memref<1x32xf32, #tpu.memory_space<vmem>>, %arg4: memref<32x96xbf16, #tpu.memory_space<vmem>>, %arg5: memref<32x32xbf16, #tpu.memory_space<vmem>>, %arg6: memref<1x1x8xf32, #tpu.memory_space<vmem>>, %arg7: memref<1x8x32xf32, #tpu.memory_space<vmem>>) attributes {dimension_semantics = [#tpu.dimension_semantics<parallel>], iteration_bounds = array<i64: 2>, scalar_prefetch = 0 : i64, scratch_operands = 0 : i64, tpu.core_type = #tpu.core_type<tc>, window_params = [{transform_indices = @transform_0, window_bounds = array<i64: 1, 8, 32>}, {transform_indices = @transform_1, window_bounds = array<i64: 1, 8, 32>}, {pipeline_mode = #tpu.pipeline_mode<synchronous>, transform_indices = @transform_2, window_bounds = array<i64: 1, 32>}, {pipeline_mode = #tpu.pipeline_mode<synchronous>, transform_indices = @transform_3, window_bounds = array<i64: 32, 96>}, {pipeline_mode = #tpu.pipeline_mode<synchronous>, transform_indices = @transform_4, window_bounds = array<i64: 32, 32>}, {transform_indices = @transform_5, window_bounds = array<i64: 1, 1, 8>}, {transform_indices = @transform_6, window_bounds = array<i64: 1, 8, 32>}]} {
    %c0 = arith.constant 0 : index
    %c0_0 = arith.constant 0 : index
    %c0_1 = arith.constant 0 : index
    %0 = vector.load %arg1[%c0, %c0_0, %c0_1] : memref<1x8x32xf32, #tpu.memory_space<vmem>>, vector<1x8x32xf32>
    %1 = vector.shape_cast %0 : vector<1x8x32xf32> to vector<8x32xf32>
    %c0_2 = arith.constant 0 : index
    %c0_3 = arith.constant 0 : index
    %2 = vector.load %arg3[%c0_2, %c0_3] : memref<1x32xf32, #tpu.memory_space<vmem>>, vector<1x32xf32>
    %3 = arith.mulf %1, %1 : vector<8x32xf32>
    %cst = arith.constant dense<0.000000e+00> : vector<8xf32>
    %4 = vector.multi_reduction <add>, %3, %cst [1] : vector<8x32xf32> to vector<8xf32>
    %5 = vector.shape_cast %4 : vector<8xf32> to vector<8x1xf32>
    %cst_4 = arith.constant 3.200000e+01 : f32
    %6 = vector.broadcast %cst_4 : f32 to vector<8x1xf32>
    %7 = arith.divf %5, %6 : vector<8x1xf32>
    %cst_5 = arith.constant 9.99999997E-7 : f32
    %8 = vector.broadcast %cst_5 : f32 to vector<8x1xf32>
    %9 = arith.addf %7, %8 : vector<8x1xf32>
    %10 = math.rsqrt %9 : vector<8x1xf32>
    %11 = vector.broadcast %10 : vector<8x1xf32> to vector<8x32xf32>
    %12 = arith.mulf %1, %11 : vector<8x32xf32>
    %13 = vector.broadcast %2 : vector<1x32xf32> to vector<8x32xf32>
    %14 = arith.mulf %12, %13 : vector<8x32xf32>
    %15 = arith.truncf %14 : vector<8x32xf32> to vector<8x32xbf16>
    %c0_6 = arith.constant 0 : index
    %c0_7 = arith.constant 0 : index
    %16 = vector.load %arg4[%c0_6, %c0_7] : memref<32x96xbf16, #tpu.memory_space<vmem>>, vector<32x96xbf16>
    %c0_8 = arith.constant 0 : index
    %c0_9 = arith.constant 0 : index
    %c0_10 = arith.constant 0 : index
    %17 = vector.load %arg2[%c0_8, %c0_9, %c0_10] : memref<1x8x32xf32, #tpu.memory_space<vmem>>, vector<1x8x32xf32>
    %18 = vector.shape_cast %17 : vector<1x8x32xf32> to vector<8x32xf32>
    %19 = arith.truncf %18 : vector<8x32xf32> to vector<8x32xbf16>
    %20 = vector.extract_strided_slice %16 {offsets = [0, 0], sizes = [32, 32], strides = [1, 1]} : vector<32x96xbf16> to vector<32x32xbf16>
    %cst_11 = arith.constant dense<0.000000e+00> : vector<8x32xf32>
    %21 = tpu.matmul %15, %20, %cst_11 {dimension_numbers = #tpu.dot_dimension_numbers<[1], [0], [0], [1], [0, 0, 1, 1], [], []>} : vector<8x32xbf16>, vector<32x32xbf16>, vector<8x32xf32> -> vector<8x32xf32>
    %22 = vector.extract_strided_slice %16 {offsets = [0, 32], sizes = [32, 64], strides = [1, 1]} : vector<32x96xbf16> to vector<32x64xbf16>
    %cst_12 = arith.constant dense<0.000000e+00> : vector<8x64xf32>
    %23 = tpu.matmul %19, %22, %cst_12 {dimension_numbers = #tpu.dot_dimension_numbers<[1], [0], [0], [1], [0, 0, 1, 1], [], []>} : vector<8x32xbf16>, vector<32x64xbf16>, vector<8x64xf32> -> vector<8x64xf32>
    %24 = vector.extract_strided_slice %23 {offsets = [0, 0], sizes = [8, 32], strides = [1, 1]} : vector<8x64xf32> to vector<8x32xf32>
    %25 = vector.extract_strided_slice %23 {offsets = [0, 32], sizes = [8, 32], strides = [1, 1]} : vector<8x64xf32> to vector<8x32xf32>
    %26 = vector.extract_strided_slice %21 {offsets = [0, 0], sizes = [8, 16], strides = [1, 1]} : vector<8x32xf32> to vector<8x16xf32>
    %27 = vector.extract_strided_slice %21 {offsets = [0, 16], sizes = [8, 16], strides = [1, 1]} : vector<8x32xf32> to vector<8x16xf32>
    %28 = vector.shape_cast %26 : vector<8x16xf32> to vector<1x8x16xf32>
    %29 = vector.shape_cast %27 : vector<8x16xf32> to vector<1x8x16xf32>
    %30 = tpu.concatenate %28, %29 in 0 : vector<1x8x16xf32>, vector<1x8x16xf32> -> vector<2x8x16xf32>
    %31 = arith.truncf %30 : vector<2x8x16xf32> to vector<2x8x16xbf16>
    %32 = vector.extract_strided_slice %24 {offsets = [0, 0], sizes = [8, 16], strides = [1, 1]} : vector<8x32xf32> to vector<8x16xf32>
    %33 = vector.extract_strided_slice %24 {offsets = [0, 16], sizes = [8, 16], strides = [1, 1]} : vector<8x32xf32> to vector<8x16xf32>
    %34 = vector.shape_cast %32 : vector<8x16xf32> to vector<1x8x16xf32>
    %35 = vector.shape_cast %33 : vector<8x16xf32> to vector<1x8x16xf32>
    %36 = tpu.concatenate %34, %35 in 0 : vector<1x8x16xf32>, vector<1x8x16xf32> -> vector<2x8x16xf32>
    %37 = arith.truncf %36 : vector<2x8x16xf32> to vector<2x8x16xbf16>
    %38 = vector.extract_strided_slice %25 {offsets = [0, 0], sizes = [8, 16], strides = [1, 1]} : vector<8x32xf32> to vector<8x16xf32>
    %39 = vector.extract_strided_slice %25 {offsets = [0, 16], sizes = [8, 16], strides = [1, 1]} : vector<8x32xf32> to vector<8x16xf32>
    %40 = vector.shape_cast %38 : vector<8x16xf32> to vector<1x8x16xf32>
    %41 = vector.shape_cast %39 : vector<8x16xf32> to vector<1x8x16xf32>
    %42 = tpu.concatenate %40, %41 in 0 : vector<1x8x16xf32>, vector<1x8x16xf32> -> vector<2x8x16xf32>
    %43 = arith.truncf %42 : vector<2x8x16xf32> to vector<2x8x16xbf16>
    "tpu.trace_start"() <{level = 10 : i32, message = "hqd,hkd->hqk"}> : () -> ()
    %cst_13 = arith.constant dense<0.000000e+00> : vector<2x8x8xf32>
    %44 = tpu.matmul %31, %37, %cst_13 {dimension_numbers = #tpu.dot_dimension_numbers<[2], [2], [1], [1], [0, 0, 0, 1, 1, 1], [0], [0]>} : vector<2x8x16xbf16>, vector<2x8x16xbf16>, vector<2x8x8xf32> -> vector<2x8x8xf32>
    "tpu.trace_stop"() : () -> ()
    %c0_14 = arith.constant 0 : index
    %c0_15 = arith.constant 0 : index
    %c0_16 = arith.constant 0 : index
    %45 = vector.load %arg6[%c0_14, %c0_15, %c0_16] : memref<1x1x8xf32, #tpu.memory_space<vmem>>, vector<1x1x8xf32>
    %cst_17 = arith.constant 1.000000e+00 : f32
    %46 = vector.broadcast %cst_17 : f32 to vector<1x1x8xf32>
    %47 = arith.subf %46, %45 : vector<1x1x8xf32>
    %cst_18 = arith.constant -1.000000e+09 : f32
    %48 = vector.broadcast %cst_18 : f32 to vector<1x1x8xf32>
    %49 = arith.mulf %47, %48 : vector<1x1x8xf32>
    %50 = vector.broadcast %49 : vector<1x1x8xf32> to vector<2x8x8xf32>
    %51 = arith.addf %44, %50 : vector<2x8x8xf32>
    %cst_19 = arith.constant dense<0xFF800000> : vector<2x8xf32>
    %52 = vector.multi_reduction <maximumf>, %51, %cst_19 [2] : vector<2x8x8xf32> to vector<2x8xf32>
    %53 = vector.shape_cast %52 : vector<2x8xf32> to vector<2x8x1xf32>
    %54 = vector.broadcast %53 : vector<2x8x1xf32> to vector<2x8x8xf32>
    %55 = arith.subf %51, %54 : vector<2x8x8xf32>
    %56 = math.exp %55 : vector<2x8x8xf32>
    %cst_20 = arith.constant dense<0.000000e+00> : vector<2x8xf32>
    %57 = vector.multi_reduction <add>, %56, %cst_20 [2] : vector<2x8x8xf32> to vector<2x8xf32>
    %58 = vector.shape_cast %57 : vector<2x8xf32> to vector<2x8x1xf32>
    %59 = tpu.reciprocal %58 {approx = true} : vector<2x8x1xf32> -> vector<2x8x1xf32>
    %60 = vector.broadcast %59 : vector<2x8x1xf32> to vector<2x8x8xf32>
    %61 = arith.mulf %56, %60 : vector<2x8x8xf32>
    %62 = arith.truncf %61 : vector<2x8x8xf32> to vector<2x8x8xbf16>
    "tpu.trace_start"() <{level = 10 : i32, message = "hqk,hkd->hqd"}> : () -> ()
    %cst_21 = arith.constant dense<0.000000e+00> : vector<2x8x16xf32>
    %63 = tpu.matmul %62, %43, %cst_21 {dimension_numbers = #tpu.dot_dimension_numbers<[2], [1], [1], [2], [0, 0, 0, 1, 1, 2], [0], [0]>} : vector<2x8x8xbf16>, vector<2x8x16xbf16>, vector<2x8x16xf32> -> vector<2x8x16xf32>
    "tpu.trace_stop"() : () -> ()
    %64 = vector.extract_strided_slice %63 {offsets = [0, 0, 0], sizes = [1, 8, 16], strides = [1, 1, 1]} : vector<2x8x16xf32> to vector<1x8x16xf32>
    %65 = vector.shape_cast %64 : vector<1x8x16xf32> to vector<8x16xf32>
    %66 = vector.extract_strided_slice %63 {offsets = [1, 0, 0], sizes = [1, 8, 16], strides = [1, 1, 1]} : vector<2x8x16xf32> to vector<1x8x16xf32>
    %67 = vector.shape_cast %66 : vector<1x8x16xf32> to vector<8x16xf32>
    %68 = tpu.concatenate %65, %67 in 1 : vector<8x16xf32>, vector<8x16xf32> -> vector<8x32xf32>
    %69 = arith.truncf %68 : vector<8x32xf32> to vector<8x32xbf16>
    %c0_22 = arith.constant 0 : index
    %c0_23 = arith.constant 0 : index
    %70 = vector.load %arg5[%c0_22, %c0_23] : memref<32x32xbf16, #tpu.memory_space<vmem>>, vector<32x32xbf16>
    %cst_24 = arith.constant dense<0.000000e+00> : vector<8x32xf32>
    %71 = tpu.matmul %69, %70, %cst_24 {dimension_numbers = #tpu.dot_dimension_numbers<[1], [0], [0], [1], [0, 0, 1, 1], [], []>} : vector<8x32xbf16>, vector<32x32xbf16>, vector<8x32xf32> -> vector<8x32xf32>
    %72 = arith.addf %1, %71 : vector<8x32xf32>
    %73 = vector.shape_cast %72 : vector<8x32xf32> to vector<1x8x32xf32>
    %c0_25 = arith.constant 0 : index
    %c0_26 = arith.constant 0 : index
    %c0_27 = arith.constant 0 : index
    %74 = vector.load %arg7[%c0_25, %c0_26, %c0_27] : memref<1x8x32xf32, #tpu.memory_space<vmem>>, vector<1x8x32xf32>
    tpu.vector_store %arg7[%c0_25, %c0_26, %c0_27], %73 {strides = array<i32>} : memref<1x8x32xf32, #tpu.memory_space<vmem>>, vector<1x8x32xf32>,
    return
  }
  func.func @transform_0(%arg0: i32) -> (i32, i32, i32) {
    %c0_i32 = arith.constant 0 : i32
    %c0_i32_0 = arith.constant 0 : i32
    %c0_i32_1 = arith.constant 0 : i32
    return %arg0, %c0_i32, %c0_i32_0 : i32, i32, i32
  }
  func.func @transform_1(%arg0: i32) -> (i32, i32, i32) {
    %c0_i32 = arith.constant 0 : i32
    %c0_i32_0 = arith.constant 0 : i32
    %c0_i32_1 = arith.constant 0 : i32
    return %arg0, %c0_i32, %c0_i32_0 : i32, i32, i32
  }
  func.func @transform_2(%arg0: i32) -> (i32, i32) {
    %c0_i32 = arith.constant 0 : i32
    %c0_i32_0 = arith.constant 0 : i32
    %c0_i32_1 = arith.constant 0 : i32
    return %c0_i32, %c0_i32_0 : i32, i32
  }
  func.func @transform_3(%arg0: i32) -> (i32, i32) {
    %c0_i32 = arith.constant 0 : i32
    %c0_i32_0 = arith.constant 0 : i32
    %c0_i32_1 = arith.constant 0 : i32
    return %c0_i32, %c0_i32_0 : i32, i32
  }
  func.func @transform_4(%arg0: i32) -> (i32, i32) {
    %c0_i32 = arith.constant 0 : i32
    %c0_i32_0 = arith.constant 0 : i32
    %c0_i32_1 = arith.constant 0 : i32
    return %c0_i32, %c0_i32_0 : i32, i32
  }
  func.func @transform_5(%arg0: i32) -> (i32, i32, i32) {
    %c0_i32 = arith.constant 0 : i32
    %c0_i32_0 = arith.constant 0 : i32
    %c0_i32_1 = arith.constant 0 : i32
    return %arg0, %c0_i32, %c0_i32_0 : i32, i32, i32
  }
  func.func @transform_6(%arg0: i32) -> (i32, i32, i32) {
    %c0_i32 = arith.constant 0 : i32
    %c0_i32_0 = arith.constant 0 : i32
    %c0_i32_1 = arith.constant 0 : i32
    return %arg0, %c0_i32, %c0_i32_0 : i32, i32, i32
  }
}

module attributes {stable_mosaic.version = 11 : i64} {
  func.func @_ffn_block_kernel(%arg0: i32, %arg1: memref<16x32xf32, #tpu.memory_space<vmem>>, %arg2: memref<1x32xf32, #tpu.memory_space<vmem>>, %arg3: memref<32x64xbf16, #tpu.memory_space<vmem>>, %arg4: memref<64x32xbf16, #tpu.memory_space<vmem>>, %arg5: memref<1x32xf32, #tpu.memory_space<vmem>>, %arg6: memref<16x32xf32, #tpu.memory_space<vmem>>) attributes {dimension_semantics = [#tpu.dimension_semantics<parallel>], iteration_bounds = array<i64: 1>, scalar_prefetch = 0 : i64, scratch_operands = 0 : i64, tpu.core_type = #tpu.core_type<tc>, window_params = [{transform_indices = @transform_0, window_bounds = array<i64: 16, 32>}, {pipeline_mode = #tpu.pipeline_mode<synchronous>, transform_indices = @transform_1, window_bounds = array<i64: 1, 32>}, {pipeline_mode = #tpu.pipeline_mode<synchronous>, transform_indices = @transform_2, window_bounds = array<i64: 32, 64>}, {pipeline_mode = #tpu.pipeline_mode<synchronous>, transform_indices = @transform_3, window_bounds = array<i64: 64, 32>}, {pipeline_mode = #tpu.pipeline_mode<synchronous>, transform_indices = @transform_4, window_bounds = array<i64: 1, 32>}, {transform_indices = @transform_5, window_bounds = array<i64: 16, 32>}]} {
    %c0 = arith.constant 0 : index
    %c0_0 = arith.constant 0 : index
    %0 = vector.load %arg1[%c0, %c0_0] : memref<16x32xf32, #tpu.memory_space<vmem>>, vector<16x32xf32>
    %c0_1 = arith.constant 0 : index
    %c0_2 = arith.constant 0 : index
    %1 = vector.load %arg2[%c0_1, %c0_2] : memref<1x32xf32, #tpu.memory_space<vmem>>, vector<1x32xf32>
    %2 = arith.mulf %0, %0 : vector<16x32xf32>
    %cst = arith.constant dense<0.000000e+00> : vector<16xf32>
    %3 = vector.multi_reduction <add>, %2, %cst [1] : vector<16x32xf32> to vector<16xf32>
    %4 = vector.shape_cast %3 : vector<16xf32> to vector<16x1xf32>
    %cst_3 = arith.constant 3.200000e+01 : f32
    %5 = vector.broadcast %cst_3 : f32 to vector<16x1xf32>
    %6 = arith.divf %4, %5 : vector<16x1xf32>
    %cst_4 = arith.constant 9.99999997E-7 : f32
    %7 = vector.broadcast %cst_4 : f32 to vector<16x1xf32>
    %8 = arith.addf %6, %7 : vector<16x1xf32>
    %9 = math.rsqrt %8 : vector<16x1xf32>
    %10 = vector.broadcast %9 : vector<16x1xf32> to vector<16x32xf32>
    %11 = arith.mulf %0, %10 : vector<16x32xf32>
    %12 = vector.broadcast %1 : vector<1x32xf32> to vector<16x32xf32>
    %13 = arith.mulf %11, %12 : vector<16x32xf32>
    %14 = arith.truncf %13 : vector<16x32xf32> to vector<16x32xbf16>
    %c0_5 = arith.constant 0 : index
    %c0_6 = arith.constant 0 : index
    %15 = vector.load %arg3[%c0_5, %c0_6] : memref<32x64xbf16, #tpu.memory_space<vmem>>, vector<32x64xbf16>
    %cst_7 = arith.constant dense<0.000000e+00> : vector<16x64xf32>
    %16 = tpu.matmul %14, %15, %cst_7 {dimension_numbers = #tpu.dot_dimension_numbers<[1], [0], [0], [1], [0, 0, 1, 1], [], []>} : vector<16x32xbf16>, vector<32x64xbf16>, vector<16x64xf32> -> vector<16x64xf32>
    %cst_8 = arith.constant 0.000000e+00 : f32
    %17 = vector.broadcast %cst_8 : f32 to vector<16x64xf32>
    %18 = arith.maximumf %16, %17 : vector<16x64xf32>
    %19 = arith.truncf %18 : vector<16x64xf32> to vector<16x64xbf16>
    %c0_9 = arith.constant 0 : index
    %c0_10 = arith.constant 0 : index
    %20 = vector.load %arg4[%c0_9, %c0_10] : memref<64x32xbf16, #tpu.memory_space<vmem>>, vector<64x32xbf16>
    %cst_11 = arith.constant dense<0.000000e+00> : vector<16x32xf32>
    %21 = tpu.matmul %19, %20, %cst_11 {dimension_numbers = #tpu.dot_dimension_numbers<[1], [0], [0], [1], [0, 0, 1, 1], [], []>} : vector<16x64xbf16>, vector<64x32xbf16>, vector<16x32xf32> -> vector<16x32xf32>
    %22 = arith.addf %0, %21 : vector<16x32xf32>
    %c0_12 = arith.constant 0 : index
    %c0_13 = arith.constant 0 : index
    %23 = vector.load %arg6[%c0_12, %c0_13] : memref<16x32xf32, #tpu.memory_space<vmem>>, vector<16x32xf32>
    tpu.vector_store %arg6[%c0_12, %c0_13], %22 {strides = array<i32>} : memref<16x32xf32, #tpu.memory_space<vmem>>, vector<16x32xf32>,
    return
  }
  func.func @transform_0(%arg0: i32) -> (i32, i32) {
    %c0_i32 = arith.constant 0 : i32
    %c0_i32_0 = arith.constant 0 : i32
    return %arg0, %c0_i32 : i32, i32
  }
  func.func @transform_1(%arg0: i32) -> (i32, i32) {
    %c0_i32 = arith.constant 0 : i32
    %c0_i32_0 = arith.constant 0 : i32
    %c0_i32_1 = arith.constant 0 : i32
    return %c0_i32, %c0_i32_0 : i32, i32
  }
  func.func @transform_2(%arg0: i32) -> (i32, i32) {
    %c0_i32 = arith.constant 0 : i32
    %c0_i32_0 = arith.constant 0 : i32
    %c0_i32_1 = arith.constant 0 : i32
    return %c0_i32, %c0_i32_0 : i32, i32
  }
  func.func @transform_3(%arg0: i32) -> (i32, i32) {
    %c0_i32 = arith.constant 0 : i32
    %c0_i32_0 = arith.constant 0 : i32
    %c0_i32_1 = arith.constant 0 : i32
    return %c0_i32, %c0_i32_0 : i32, i32
  }
  func.func @transform_4(%arg0: i32) -> (i32, i32) {
    %c0_i32 = arith.constant 0 : i32
    %c0_i32_0 = arith.constant 0 : i32
    %c0_i32_1 = arith.constant 0 : i32
    return %c0_i32, %c0_i32_0 : i32, i32
  }
  func.func @transform_5(%arg0: i32) -> (i32, i32) {
    %c0_i32 = arith.constant 0 : i32
    %c0_i32_0 = arith.constant 0 : i32
    return %arg0, %c0_i32 : i32, i32
  }
}

module attributes {stable_mosaic.version = 11 : i64} {
  func.func @_lmhead_ce_kernel(%arg0: i32, %arg1: i32, %arg2: memref<16x32xf32, #tpu.memory_space<vmem>>, %arg3: memref<1x32xf32, #tpu.memory_space<vmem>>, %arg4: memref<128x32xbf16, #tpu.memory_space<vmem>>, %arg5: memref<16x1xi32, #tpu.memory_space<vmem>>, %arg6: memref<16x1xf32, #tpu.memory_space<vmem>>, %arg7: memref<16x32xbf16, #tpu.memory_space<vmem>>, %arg8: memref<16x1xf32, #tpu.memory_space<vmem>>, %arg9: memref<16x1xf32, #tpu.memory_space<vmem>>, %arg10: memref<16x1xf32, #tpu.memory_space<vmem>>) attributes {dimension_semantics = [#tpu.dimension_semantics<parallel>, #tpu.dimension_semantics<arbitrary>], iteration_bounds = array<i64: 1, 1>, scalar_prefetch = 0 : i64, scratch_operands = 4 : i64, tpu.core_type = #tpu.core_type<tc>, window_params = [{transform_indices = @transform_0, window_bounds = array<i64: 16, 32>}, {pipeline_mode = #tpu.pipeline_mode<synchronous>, transform_indices = @transform_1, window_bounds = array<i64: 1, 32>}, {transform_indices = @transform_2, window_bounds = array<i64: 128, 32>}, {transform_indices = @transform_3, window_bounds = array<i64: 16, 1>}, {transform_indices = @transform_4, window_bounds = array<i64: 16, 1>}]} {
    %c0_i32 = arith.constant 0 : i32
    %0 = arith.cmpi eq, %arg1, %c0_i32 : i32
    %1 = arith.extui %0 : i1 to i32
    %c0_i32_0 = arith.constant 0 : i32
    %2 = arith.cmpi ne, %1, %c0_i32_0 : i32
    scf.if %2 {
      %c0_25 = arith.constant 0 : index
      %c0_26 = arith.constant 0 : index
      %41 = vector.load %arg2[%c0_25, %c0_26] : memref<16x32xf32, #tpu.memory_space<vmem>>, vector<16x32xf32>
      %c0_27 = arith.constant 0 : index
      %c0_28 = arith.constant 0 : index
      %42 = vector.load %arg3[%c0_27, %c0_28] : memref<1x32xf32, #tpu.memory_space<vmem>>, vector<1x32xf32>
      %43 = arith.mulf %41, %41 : vector<16x32xf32>
      %cst_29 = arith.constant dense<0.000000e+00> : vector<16xf32>
      %44 = vector.multi_reduction <add>, %43, %cst_29 [1] : vector<16x32xf32> to vector<16xf32>
      %45 = vector.shape_cast %44 : vector<16xf32> to vector<16x1xf32>
      %cst_30 = arith.constant 3.200000e+01 : f32
      %46 = vector.broadcast %cst_30 : f32 to vector<16x1xf32>
      %47 = arith.divf %45, %46 : vector<16x1xf32>
      %cst_31 = arith.constant 9.99999997E-7 : f32
      %48 = vector.broadcast %cst_31 : f32 to vector<16x1xf32>
      %49 = arith.addf %47, %48 : vector<16x1xf32>
      %50 = math.rsqrt %49 : vector<16x1xf32>
      %51 = vector.broadcast %50 : vector<16x1xf32> to vector<16x32xf32>
      %52 = arith.mulf %41, %51 : vector<16x32xf32>
      %53 = vector.broadcast %42 : vector<1x32xf32> to vector<16x32xf32>
      %54 = arith.mulf %52, %53 : vector<16x32xf32>
      %cst_32 = arith.constant 0.176776692 : f32
      %55 = vector.broadcast %cst_32 : f32 to vector<16x32xf32>
      %56 = arith.mulf %54, %55 : vector<16x32xf32>
      %57 = arith.truncf %56 : vector<16x32xf32> to vector<16x32xbf16>
      %c0_33 = arith.constant 0 : index
      %c0_34 = arith.constant 0 : index
      %58 = vector.load %arg7[%c0_33, %c0_34] : memref<16x32xbf16, #tpu.memory_space<vmem>>, vector<16x32xbf16>
      tpu.vector_store %arg7[%c0_33, %c0_34], %57 {strides = array<i32>} : memref<16x32xbf16, #tpu.memory_space<vmem>>, vector<16x32xbf16>,
      %cst_35 = arith.constant -1.000000e+30 : f32
      %59 = vector.broadcast %cst_35 : f32 to vector<16x1xf32>
      %c0_36 = arith.constant 0 : index
      %c0_37 = arith.constant 0 : index
      %60 = vector.load %arg8[%c0_36, %c0_37] : memref<16x1xf32, #tpu.memory_space<vmem>>, vector<16x1xf32>
      tpu.vector_store %arg8[%c0_36, %c0_37], %59 {strides = array<i32>} : memref<16x1xf32, #tpu.memory_space<vmem>>, vector<16x1xf32>,
      %cst_38 = arith.constant 0.000000e+00 : f32
      %61 = vector.broadcast %cst_38 : f32 to vector<16x1xf32>
      %c0_39 = arith.constant 0 : index
      %c0_40 = arith.constant 0 : index
      %62 = vector.load %arg9[%c0_39, %c0_40] : memref<16x1xf32, #tpu.memory_space<vmem>>, vector<16x1xf32>
      tpu.vector_store %arg9[%c0_39, %c0_40], %61 {strides = array<i32>} : memref<16x1xf32, #tpu.memory_space<vmem>>, vector<16x1xf32>,
      %cst_41 = arith.constant 0.000000e+00 : f32
      %63 = vector.broadcast %cst_41 : f32 to vector<16x1xf32>
      %c0_42 = arith.constant 0 : index
      %c0_43 = arith.constant 0 : index
      %64 = vector.load %arg10[%c0_42, %c0_43] : memref<16x1xf32, #tpu.memory_space<vmem>>, vector<16x1xf32>
      tpu.vector_store %arg10[%c0_42, %c0_43], %63 {strides = array<i32>} : memref<16x1xf32, #tpu.memory_space<vmem>>, vector<16x1xf32>,
    } else {
    }
    %c0 = arith.constant 0 : index
    %c0_1 = arith.constant 0 : index
    %3 = vector.load %arg7[%c0, %c0_1] : memref<16x32xbf16, #tpu.memory_space<vmem>>, vector<16x32xbf16>
    %c0_2 = arith.constant 0 : index
    %c0_3 = arith.constant 0 : index
    %4 = vector.load %arg4[%c0_2, %c0_3] : memref<128x32xbf16, #tpu.memory_space<vmem>>, vector<128x32xbf16>
    %cst = arith.constant dense<0.000000e+00> : vector<16x128xf32>
    %5 = tpu.matmul %3, %4, %cst {dimension_numbers = #tpu.dot_dimension_numbers<[1], [1], [0], [0], [0, 0, 1, 0], [], []>} : vector<16x32xbf16>, vector<128x32xbf16>, vector<16x128xf32> -> vector<16x128xf32>
    %c0_4 = arith.constant 0 : index
    %c0_5 = arith.constant 0 : index
    %6 = vector.load %arg5[%c0_4, %c0_5] : memref<16x1xi32, #tpu.memory_space<vmem>>, vector<16x1xi32>
    %7 = tpu.iota {dimensions = array<i32: 1>} : vector<16x128xi32>
    %c128_i32 = arith.constant 128 : i32
    %8 = arith.muli %arg1, %c128_i32 : i32
    %9 = vector.broadcast %8 : i32 to vector<16x128xi32>
    %10 = arith.addi %7, %9 : vector<16x128xi32>
    %11 = vector.broadcast %6 : vector<16x1xi32> to vector<16x128xi32>
    %12 = arith.cmpi eq, %10, %11 : vector<16x128xi32>
    %13 = arith.extui %12 : vector<16x128xi1> to vector<16x128xi32>
    %14 = arith.sitofp %13 : vector<16x128xi32> to vector<16x128xf32>
    %c0_6 = arith.constant 0 : index
    %c0_7 = arith.constant 0 : index
    %15 = vector.load %arg10[%c0_6, %c0_7] : memref<16x1xf32, #tpu.memory_space<vmem>>, vector<16x1xf32>
    %16 = arith.mulf %5, %14 : vector<16x128xf32>
    %cst_8 = arith.constant dense<0.000000e+00> : vector<16xf32>
    %17 = vector.multi_reduction <add>, %16, %cst_8 [1] : vector<16x128xf32> to vector<16xf32>
    %18 = vector.shape_cast %17 : vector<16xf32> to vector<16x1xf32>
    %19 = arith.addf %15, %18 : vector<16x1xf32>
    %c0_9 = arith.constant 0 : index
    %c0_10 = arith.constant 0 : index
    %20 = vector.load %arg10[%c0_9, %c0_10] : memref<16x1xf32, #tpu.memory_space<vmem>>, vector<16x1xf32>
    tpu.vector_store %arg10[%c0_9, %c0_10], %19 {strides = array<i32>} : memref<16x1xf32, #tpu.memory_space<vmem>>, vector<16x1xf32>,
    %cst_11 = arith.constant dense<0xFF800000> : vector<16xf32>
    %21 = vector.multi_reduction <maximumf>, %5, %cst_11 [1] : vector<16x128xf32> to vector<16xf32>
    %22 = vector.shape_cast %21 : vector<16xf32> to vector<16x1xf32>
    %c0_12 = arith.constant 0 : index
    %c0_13 = arith.constant 0 : index
    %23 = vector.load %arg8[%c0_12, %c0_13] : memref<16x1xf32, #tpu.memory_space<vmem>>, vector<16x1xf32>
    %24 = arith.maximumf %23, %22 : vector<16x1xf32>
    %c0_14 = arith.constant 0 : index
    %c0_15 = arith.constant 0 : index
    %25 = vector.load %arg9[%c0_14, %c0_15] : memref<16x1xf32, #tpu.memory_space<vmem>>, vector<16x1xf32>
    %c0_16 = arith.constant 0 : index
    %c0_17 = arith.constant 0 : index
    %26 = vector.load %arg8[%c0_16, %c0_17] : memref<16x1xf32, #tpu.memory_space<vmem>>, vector<16x1xf32>
    %27 = arith.subf %26, %24 : vector<16x1xf32>
    %28 = math.exp %27 : vector<16x1xf32>
    %29 = arith.mulf %25, %28 : vector<16x1xf32>
    %30 = vector.broadcast %24 : vector<16x1xf32> to vector<16x128xf32>
    %31 = arith.subf %5, %30 : vector<16x128xf32>
    %32 = math.exp %31 : vector<16x128xf32>
    %cst_18 = arith.constant dense<0.000000e+00> : vector<16xf32>
    %33 = vector.multi_reduction <add>, %32, %cst_18 [1] : vector<16x128xf32> to vector<16xf32>
    %34 = vector.shape_cast %33 : vector<16xf32> to vector<16x1xf32>
    %35 = arith.addf %29, %34 : vector<16x1xf32>
    %c0_19 = arith.constant 0 : index
    %c0_20 = arith.constant 0 : index
    %36 = vector.load %arg9[%c0_19, %c0_20] : memref<16x1xf32, #tpu.memory_space<vmem>>, vector<16x1xf32>
    tpu.vector_store %arg9[%c0_19, %c0_20], %35 {strides = array<i32>} : memref<16x1xf32, #tpu.memory_space<vmem>>, vector<16x1xf32>,
    %c0_21 = arith.constant 0 : index
    %c0_22 = arith.constant 0 : index
    %37 = vector.load %arg8[%c0_21, %c0_22] : memref<16x1xf32, #tpu.memory_space<vmem>>, vector<16x1xf32>
    tpu.vector_store %arg8[%c0_21, %c0_22], %24 {strides = array<i32>} : memref<16x1xf32, #tpu.memory_space<vmem>>, vector<16x1xf32>,
    %c0_i32_23 = arith.constant 0 : i32
    %38 = arith.cmpi eq, %arg1, %c0_i32_23 : i32
    %39 = arith.extui %38 : i1 to i32
    %c0_i32_24 = arith.constant 0 : i32
    %40 = arith.cmpi ne, %39, %c0_i32_24 : i32
    scf.if %40 {
      %c-100_i32 = arith.constant -100 : i32
      %41 = vector.broadcast %c-100_i32 : i32 to vector<16x1xi32>
      %42 = arith.cmpi ne, %6, %41 : vector<16x1xi32>
      %43 = arith.extui %42 : vector<16x1xi1> to vector<16x1xi32>
      %44 = arith.sitofp %43 : vector<16x1xi32> to vector<16x1xf32>
      %c0_25 = arith.constant 0 : index
      %c0_26 = arith.constant 0 : index
      %45 = vector.load %arg8[%c0_25, %c0_26] : memref<16x1xf32, #tpu.memory_space<vmem>>, vector<16x1xf32>
      %c0_27 = arith.constant 0 : index
      %c0_28 = arith.constant 0 : index
      %46 = vector.load %arg9[%c0_27, %c0_28] : memref<16x1xf32, #tpu.memory_space<vmem>>, vector<16x1xf32>
      %47 = math.log %46 : vector<16x1xf32>
      %48 = arith.addf %45, %47 : vector<16x1xf32>
      %c0_29 = arith.constant 0 : index
      %c0_30 = arith.constant 0 : index
      %49 = vector.load %arg10[%c0_29, %c0_30] : memref<16x1xf32, #tpu.memory_space<vmem>>, vector<16x1xf32>
      %50 = arith.subf %48, %49 : vector<16x1xf32>
      %51 = arith.mulf %50, %44 : vector<16x1xf32>
      %c0_31 = arith.constant 0 : index
      %c0_32 = arith.constant 0 : index
      %52 = vector.load %arg6[%c0_31, %c0_32] : memref<16x1xf32, #tpu.memory_space<vmem>>, vector<16x1xf32>
      tpu.vector_store %arg6[%c0_31, %c0_32], %51 {strides = array<i32>} : memref<16x1xf32, #tpu.memory_space<vmem>>, vector<16x1xf32>,
    } else {
    }
    return
  }
  func.func @transform_0(%arg0: i32, %arg1: i32) -> (i32, i32) {
    %c0_i32 = arith.constant 0 : i32
    %c0_i32_0 = arith.constant 0 : i32
    return %arg0, %c0_i32 : i32, i32
  }
  func.func @transform_1(%arg0: i32, %arg1: i32) -> (i32, i32) {
    %c0_i32 = arith.constant 0 : i32
    %c0_i32_0 = arith.constant 0 : i32
    %c0_i32_1 = arith.constant 0 : i32
    return %c0_i32, %c0_i32_0 : i32, i32
  }
  func.func @transform_2(%arg0: i32, %arg1: i32) -> (i32, i32) {
    %c0_i32 = arith.constant 0 : i32
    %c0_i32_0 = arith.constant 0 : i32
    return %arg1, %c0_i32 : i32, i32
  }
  func.func @transform_3(%arg0: i32, %arg1: i32) -> (i32, i32) {
    %c0_i32 = arith.constant 0 : i32
    %c0_i32_0 = arith.constant 0 : i32
    return %arg0, %c0_i32 : i32, i32
  }
  func.func @transform_4(%arg0: i32, %arg1: i32) -> (i32, i32) {
    %c0_i32 = arith.constant 0 : i32
    %c0_i32_0 = arith.constant 0 : i32
    return %arg0, %c0_i32 : i32, i32
  }
}

</mosaic_0001>

<bundles_post_ra>
// kernel: t5gen_forward.7
= control target key start
LH: loop header
LB: loop body
LE: loop exit
PB: predicated region body
PF: predicated region fallthrough
CT: control target
= control target key end

     0   :  { %vm26_vm0 = vcmask 261120   ;;  %v278_v6 = vmov 0.0   ;;  %vm279_vm1 = vmmov 0   ;;  %vm146_vm2 = vcmask 523264   ;;  %s353_s0 = inlined_call_operand.vmem [shape: f32[16,32], index: 0, kind: input, shape index: {}]   ;;  %s354_s2 = inlined_call_operand.vmem [shape: bf16[32,64], index: 2, kind: input, shape index: {}]   ;;  %s355_s3 = inlined_call_operand.vmem [shape: bf16[64,32], index: 3, kind: input, shape index: {}]   ;;  %s356_s1 = inlined_call_operand.vmem [shape: f32[1,32], index: 1, kind: input, shape index: {}]   ;;  %s357_s4 = inlined_call_operand.vmem [shape: f32[1,32], index: 4, kind: input, shape index: {}]   ;;  %s358_s5 = inlined_call_operand.vmem [shape: f32[16,32], index: 5, kind: output, shape index: {}]  }
   0x1   :  { %v21_v0 = vld [vmem:[%s353_s0] sm:$0xff]  ;;  %v22_v1 = vld [vmem:[%s353_s0 + $0x8] sm:$0xff]  ;;  %242 = vmatprep.subr.bf16.mxu0 %v278_v6  ;;  %246 = vmatprep.mubr.msk.bf16.mxu0 %vm279_vm1, %v278_v6  ;;  %v268_v25 = vld [vmem:[%s355_s3 + $0x10] sm:$0xff]  }
   0x2   :  { %v24_v2 = vmul.f32 %v21_v0, %v21_v0  ;;  %v25_v3 = vmul.f32 %v22_v1, %v22_v1  ;;  %v264_v7 = vld [vmem:[%s354_s2] sm:$0xff]   ;;  %250 = vmatprep.subr.bf16.mxu1 %v278_v6  ;;  %258 = vmatprep.mubr.msk.bf16.mxu1 %vm279_vm1, %v278_v6  ;;  %v265_v8 = vld [vmem:[%s354_s2 + $0x8] sm:$0xff]   ;;  %v269_v26 = vld [vmem:[%s355_s3 + $0x18] sm:$0xff]  }
   0x3   :  { %243 = vmatpush3.bf16.msra.mxu0 %v264_v7  ;;  %v266_v9 = vld [vmem:[%s355_s3] sm:$0xff]   ;;  %v267_v10 = vld [vmem:[%s355_s3 + $0x8] sm:$0xff]  }
   0x4   :  { %v27_v4 = vsel %vm26_vm0, %v24_v2, 0.0  ;;  %v30_v5 = vsel %vm26_vm0, %v25_v3, 0.0  ;;  %244 = vmatprep.subr.bf16.mxu0 %v278_v6  ;;  %251 = vmatpush3.bf16.msra.mxu1 %v266_v9  ;;  %v224_v20 = vld [vmem:[%s356_s1] ss:$0 sm:$0xff] }
   0x5   :  { %28 = vadd.xlane.f32.xlu0 %v27_v4  ;;  %252 = vmatprep.subr.bf16.mxu1 %v278_v6  ;;  %v233_v51 = vld [vmem:[%s357_s4] ss:$0 sm:$0xff] }
   0x7   :  { %245 = vmatpush3.bf16.msra.mxu0 %v265_v8 }
   0x8   :  { %253 = vmatpush3.bf16.msra.mxu1 %v267_v10 }
   0x9   :  { %31 = vadd.xlane.f32.xlu0 %v30_v5  ;;  %254 = vmatprep.subr.bf16.mxu1 %v278_v6 }
   0xc   :  { %255 = vmatpush3.bf16.msra.mxu1 %v268_v25 }
   0xd   :  { %256 = vmatprep.subr.bf16.mxu1 %v278_v6 }
  0x10   :  { %257 = vmatpush3.bf16.msra.mxu1 %v269_v26 }
  0x92   :  { %v29_v11 = vpop.xlane.xlu0 %28 }
  0x93   :  { %v34_v12 = vmul.f32 0.03125, %v29_v11 }
  0x95   :  { %v36_v13 = vadd.f32 1e-06, %v34_v12 }
  0x96   :  { %v32_v14 = vpop.xlane.xlu0 %31 }
  0x97   :  { %270 = vrsqrt.f32 %v36_v13  ;;  %v35_v15 = vmul.f32 0.03125, %v32_v14 }
  0x99   :  { %v37_v16 = vadd.f32 1e-06, %v35_v15 }
  0x9b   :  { %272 = vrsqrt.f32 %v37_v16 }
  0xa1   :  { %v271_v17 = vpop.eup %270 }
  0xa2   :  { %v40_v18 = vmul.f32 %v271_v17, %v21_v0 }
  0xa4   :  { %v48_v22 = vmul.f32 %v224_v20, %v40_v18 }
  0xa5   :  { %v273_v19 = vpop.eup %272 }
  0xa6   :  { %v41_v21 = vmul.f32 %v273_v19, %v22_v1 }
  0xa8   :  { %v49_v23 = vmul.f32 %v224_v20, %v41_v21 }
  0xaa   :  { %v50_v24 = vpack.c.bf16 %v49_v23, %v48_v22 }
  0xac   :  { %247 = vmatmul.mubr.msk.bf16.vlgmr.msra.gmra.mrb[0].mxu0 %vm26_vm0, %v50_v24 }
 0x17f   :  { %v104_v27 = vpop.f32.mrb[0].mxu0 }
 0x180   :  { %v248_v28 = vpop.f32.mrb[1].mxu0  ;;  %v111_v30 = vmax.f32 %v104_v27, 0.0 }
 0x181   :  { %v107_v29 = vpop.f32.mrb[2].mxu0 }
 0x182   :  { %v112_v31 = vmax.f32 %v107_v29, 0.0  ;;  %v249_v32 = vpop.f32.mrb[3].mxu0 }
 0x184   :  { %v113_v33 = vpack.c.bf16 %v112_v31, %v111_v30 }
 0x186   :  { %259 = vmatmul.mubr.msk.bf16.vlgmr.msra.gmra.mrb[0].mxu1 %vm146_vm2, %v113_v33 }
 0x259   :  { %v184_v34 = vpop.f32.mrb[0].mxu1 }
 0x25a   :  { %v191_v35 = vadd.f32 %v184_v34, %v21_v0  ;;  %v260_v36 = vpop.f32.mrb[1].mxu1 }
 0x25b   :  { %v187_v37 = vpop.f32.mrb[2].mxu1 }
 0x25c   :  { %v192_v38 = vadd.f32 %v187_v37, %v22_v1  ;;  %v261_v39 = vpop.f32.mrb[3].mxu1  ;;  %v194_v40 = vmul.f32 %v191_v35, %v191_v35 }
 0x25e   :  { %v196_v41 = vsel %vm26_vm0, %v194_v40, 0.0  ;;  %v195_v42 = vmul.f32 %v192_v38, %v192_v38 }
 0x25f   :  { %197 = vadd.xlane.f32.xlu1 %v196_v41 }
 0x260   :  { %v199_v43 = vsel %vm26_vm0, %v195_v42, 0.0 }
 0x263   :  { %200 = vadd.xlane.f32.xlu1 %v199_v43 }
 0x2ec   :  { %v198_v44 = vpop.xlane.xlu1 %197 }
 0x2ed   :  { %v202_v45 = vmul.f32 0.03125, %v198_v44 }
 0x2ef   :  { %v204_v46 = vadd.f32 1e-06, %v202_v45 }
 0x2f0   :  { %v201_v47 = vpop.xlane.xlu1 %200 }
 0x2f1   :  { %274 = vrsqrt.f32 %v204_v46  ;;  %v203_v48 = vmul.f32 0.03125, %v201_v47 }
 0x2f3   :  { %v205_v49 = vadd.f32 1e-06, %v203_v48 }
 0x2f5   :  { %276 = vrsqrt.f32 %v205_v49 }
 0x2fb   :  { %v275_v50 = vpop.eup %274 }
 0x2fc   :  { %v208_v52 = vmul.f32 %v275_v50, %v191_v35 }
 0x2fe   :  { %v216_v53 = vmul.f32 %v233_v51, %v208_v52 }
 0x2ff   :  { %v277_v54 = vpop.eup %276 }
 0x300   :  { %218 = vst.msk [vmem:[%s358_s5] sm:$0xff] %vm26_vm0, %v216_v53  ;;  %v209_v55 = vmul.f32 %v277_v54, %v192_v38 }
 0x302   :  { %v217_v56 = vmul.f32 %v233_v51, %v209_v55 }
 0x304   :  { %219 = vst.msk [vmem:[%s358_s5 + $0x8] sm:$0xff] %vm26_vm0, %v217_v56 }

// kernel: t5gen_forward.6
= control target key start
LH: loop header
LB: loop body
LE: loop exit
PB: predicated region body
PF: predicated region fallthrough
CT: control target
= control target key end

     0   :  { %s867_s21 = smov 0   ;;  %s954_s0 = inlined_call_operand.vmem [shape: f32[2,8,32], index: 0, kind: input, shape index: {}]   ;;  %s955_s1 = inlined_call_operand.vmem [shape: f32[1,32], index: 1, kind: input, shape index: {}]   ;;  %s956_s2 = inlined_call_operand.vmem [shape: bf16[32,96], index: 2, kind: input, shape index: {}]   ;;  %s957_s3 = inlined_call_operand.vmem [shape: bf16[32,32], index: 3, kind: input, shape index: {}]   ;;  %s958_s4 = inlined_call_operand.vmem [shape: bf16[2,8,8], index: 4, kind: input, shape index: {}]   ;;  %s959_s5 = inlined_call_operand.vmem [shape: f32[2,1,8], index: 5, kind: input, shape index: {}]   ;;  %s960_s6 = inlined_call_operand.vmem [shape: f32[2,8,32], index: 6, kind: output, shape index: {}]  }
   0x1 LB: > { %s712_s22 = sadd.s32 4294967295, %s824_s21   ;;  %p716_p0 = scmp.ge.s32.totalorder %s824_s21, 1  ;;  %s824_s21 = sphi %s867_s21, %s16_s21  }
   0x2   : > { %p219_p1 = scmp.lt.s32.totalorder %s824_s21, 3 }
   0x4   : > { %p220_p2 = pnand %p716_p0, %p219_p1 }
   0x5   : > { %p250_p3 = scmp.lt.s32.totalorder (!%p220_p2), %s712_s22, 1  ;;  %vm265_vm0 = vcmask (!%p220_p2), 261120   ;;  %v804_v3 = vld [vmem:[%s956_s2] sm:$0xff] (!%p220_p2)   ;;  %v826_v4 = vmov (!%p220_p2), 0.0   ;;  %vm827_vm1 = vmmov (!%p220_p2), 0   ;;  %v805_v5 = vld [vmem:[%s956_s2 + $0x8] sm:$0xff] (!%p220_p2)   ;;  %v351_v25 = vlaneseq (!%p220_p2) }
   0x6   : > { %223 = sbr.rel (%p220_p2) target bundleno = 1712 (0x6b0), region = 44  ;;  %750 = vmatprep.subr.bf16.mxu0 (!%p220_p2), %v826_v4  ;;  %754 = vmatprep.mubr.msk.bf16.mxu0 (!%p220_p2), %vm827_vm1, %v826_v4  ;;  %v719_v10 = vld [vmem:[%s955_s1] ss:$0 sm:$0xff] (!%p220_p2)  ;;  %s828_s9 = smov (!%p220_p2), 112   ;;  %vm359_vm2 = vcmask (!%p220_p2), 130048   ;;  %vm461_vm3 = vcmask (!%p220_p2), 64512  }
   0x7   : > { %751 = vmatpush3.bf16.msra.mxu0 (!%p220_p2), %v804_v3  ;;  %758 = vmatprep.subr.bf16.mxu1 (!%p220_p2), %v826_v4  ;;  %s829_s10 = smov (!%p220_p2), 96   ;;  %v352_v28 = vshrl.u32 (!%p220_p2), %v351_v25, 7  ;;  %v733_v31 = vld [vmem:[%s958_s4] sm:$0xff] (!%p220_p2)   ;;  %s830_s16 = smov (!%p220_p2), 64   ;;  %vm491_vm4 = vcmask (!%p220_p2), 1043456  }
   0x8   : > { %752 = vmatprep.subr.bf16.mxu0 (!%p220_p2), %v826_v4  ;;  %760 = vmatprep.mubr.msk.bf16.mxu1 (!%p220_p2), %vm827_vm1, %v826_v4  ;;  %v735_v33 = vunpack.c.h.bf16 (!%p220_p2), %v733_v31  ;;  %v734_v40 = vunpack.c.l.bf16 (!%p220_p2), %v733_v31  ;;  %s831_s24 = smov (!%p220_p2), 16  }
   0x9   : > { %v353_v30 = vsub.s32 (!%p220_p2), 0, %v352_v28 }
   0xb   : > { %753 = vmatpush3.bf16.msra.mxu0 (!%p220_p2), %v805_v5 }
   0xc   : > { %764 = vmatprep.subr.bf16.mxu0 (!%p220_p2), %v826_v4 }
   0xd   : > { %s962_s22 = smov (!%p250_p3, %s712_s22), 1 }
   0xe   : > { %s717_s23 = sshll.u32 %s962_s22, 3  ;;  %s256_s13 = scalar_lea.vmem %s959_s5, %s962_s22 }
   0xf   : > { %s253_s26 = scalar_lea.vmem %s954_s0, %s717_s23  ;;  %v347_v26 = vld [vmem:[%s256_s13] sm:$0x1]  ;;  %s260_s27 = scalar_lea.vmem %s960_s6, %s717_s23 }
  0x10   : > { %v883_v0 = vld [vmem:[%s253_s26] sm:$0xff]  ;;  %v348_v27 = vsub.f32 1.0, %v347_v26 }
  0x11   : > { %v264_v1 = vmul.f32 %v883_v0, %v883_v0 }
  0x12   : > { %v349_v29 = vmul.f32 -1e+09, %v348_v27 }
  0x13   : > { %v266_v2 = vsel %vm265_vm0, %v264_v1, 0.0 }
  0x14   : > { %267 = vadd.xlane.f32.xlu0 %v266_v2  ;;  %v354_v32 = vrot.slane %v349_v29, %v353_v30 }
  0xa1   : > { %v268_v6 = vpop.xlane.xlu0 %267 }
  0xa2   : > { %v270_v7 = vmul.f32 0.03125, %v268_v6 }
  0xa4   : > { %v271_v8 = vadd.f32 1e-06, %v270_v7 }
  0xa6   : > { %808 = vrsqrt.f32 %v271_v8 }
  0xb0   : > { %v809_v9 = vpop.eup %808 }
  0xb1   : > { %v273_v11 = vmul.f32 %v809_v9, %v883_v0  ;;  %v806_v9 = vld [vmem:[%s957_s3] sm:$0xff]  }
  0xb3   : > { %v280_v12 = vmul.f32 %v719_v10, %v273_v11  ;;  %v807_v10 = vld [vmem:[%s957_s3 + $0x8] sm:$0xff]  }
  0xb5   : > { %v281_v13 = vpack.c.bf16 %v280_v12, %v280_v12 }
  0xb7   : > { %755 = vmatmul.mubr.msk.bf16.vlgmr.msra.gmra.mrb[0].mxu0 %vm265_vm0, %v281_v13 }
  0xb8   : > { %766 = vmatprep.mubr.msk.bf16.mxu0 %vm827_vm1, %v826_v4 }
 0x18a   : > { %v335_v14 = vpop.f32.mrb[0].mxu0 }
 0x18b   : > { %342 = vrot.lane.b32.xlu0 %v335_v14, %s828_s9  ;;  %v756_v15 = vpop.f32.mrb[1].mxu0  ;;  %v345_v20 = vpack.c.bf16 %v335_v14, %v335_v14 }
 0x18c   : > { %v338_v16 = vpop.f32.mrb[2].mxu0 }
 0x18d   : > { %v757_v17 = vpop.f32.mrb[3].mxu0 }
 0x1fd   : > { %v343_v18 = vpop.permute.xlu0 %342 }
 0x1fe   : > { %v346_v19 = vpack.c.bf16 %v343_v18, %v343_v18 }
 0x200   : > { %407 = vrot.lane.b32.xlu1 %v346_v19, %s829_s10 }
 0x204   : > { %357 = vrot.lane.b32.xlu1 %v345_v20, %s829_s10 }
 0x272   : > { %v408_v21 = vpop.permute.xlu1 %407 }
 0x273   : > { %v413_v22 = vsel %vm359_vm2, %v408_v21, 0 }
 0x274   : > { %765 = vmatpush3.bf16.xpose.msra.mxu0 %v413_v22 }
 0x275   : > { %776 = vmatprep.subr.bf16.mxu0 %v826_v4 }
 0x276   : > { %v358_v23 = vpop.permute.xlu1 %357 }
 0x277   : > { %v364_v24 = vsel %vm359_vm2, %v358_v23, 0 }
 0x278   : > { %759 = vmatpush3.bf16.xpose.msra.mxu1 %v364_v24 }
 0x279   : > { %770 = vmatprep.subr.bf16.mxu1 %v826_v4 }
 0x27b   : > { %767 = vmatmul.mubr.msk.bf16.vlgmr.msra.gmra.mrb[4].mxu0 %vm359_vm2, %v346_v19 }
 0x27c   : > { %778 = vmatprep.mubr.msk.bf16.mxu0 %vm827_vm1, %v826_v4 }
 0x27f   : > { %761 = vmatmul.mubr.msk.bf16.vlgmr.msra.gmra.mrb[0].mxu1 %vm359_vm2, %v345_v20 }
 0x280   : > { %772 = vmatprep.mubr.msk.bf16.mxu1 %vm827_vm1, %v826_v4 }
 0x34e   : > { %v449_v34 = vpop.f32.mrb[4].mxu0 }
 0x34f   : > { %v450_v35 = vadd.f32 %v449_v34, %v354_v32  ;;  %v768_v36 = vpop.f32.mrb[5].mxu0 }
 0x350   : > { %v452_v37 = vpop.f32.mrb[6].mxu0 }
 0x351   : > { %v769_v38 = vpop.f32.mrb[7].mxu0  ;;  %v460_v39 = vadd.f32 %v735_v33, %v450_v35 }
 0x352   : > { %v400_v41 = vpop.f32.mrb[0].mxu1 }
 0x353   : > { %v401_v42 = vadd.f32 %v400_v41, %v354_v32  ;;  %v762_v43 = vpop.f32.mrb[1].mxu1  ;;  %v465_v44 = vsel %vm461_vm3, %v460_v39, -inf }
 0x354   : > { %v403_v45 = vpop.f32.mrb[2].mxu1  ;;  %466 = vmax.xlane.f32.xlu1 %v465_v44 }
 0x355   : > { %v763_v46 = vpop.f32.mrb[3].mxu1  ;;  %v459_v47 = vadd.f32 %v734_v40, %v401_v42 }
 0x357   : > { %v462_v48 = vsel %vm461_vm3, %v459_v47, -inf }
 0x358   : > { %463 = vmax.xlane.f32.xlu0 %v462_v48 }
 0x3e1   : > { %v467_v49 = vpop.xlane.xlu1 %466 }
 0x3e2   : > { %v469_v50 = vsub.f32 %v460_v39, %v467_v49 }
 0x3e4   : > { %v472_v51 = vmul.f32 1.442695, %v469_v50 }
 0x3e5   : > { %v464_v52 = vpop.xlane.xlu0 %463 }
 0x3e6   : > { %810 = vpow2.f32 %v472_v51  ;;  %v468_v53 = vsub.f32 %v459_v47, %v464_v52 }
 0x3e8   : > { %v470_v54 = vmul.f32 1.442695, %v468_v53 }
 0x3ea   : > { %812 = vpow2.f32 %v470_v54 }
 0x3f0   : > { %v811_v55 = vpop.eup %810 }
 0x3f1   : > { %v477_v56 = vsel %vm461_vm3, %v811_v55, 0.0 }
 0x3f2   : > { %478 = vadd.xlane.f32.xlu1 %v477_v56 }
 0x3f4   : > { %v813_v57 = vpop.eup %812 }
 0x3f5   : > { %v474_v58 = vsel %vm461_vm3, %v813_v57, 0.0 }
 0x3f6   : > { %475 = vadd.xlane.f32.xlu0 %v474_v58 }
 0x403   : > { %535 = vrot.lane.b32.xlu1 %v346_v19, %s830_s16 }
 0x40c   : > { %486 = vrot.lane.b32.xlu0 %v345_v20, %s830_s16 }
 0x47f   : > { %v479_v59 = vpop.xlane.xlu1 %478 }
 0x480   : > { %814 = vrcp.f32 %v479_v59 }
 0x483   : > { %v476_v60 = vpop.xlane.xlu0 %475  ;;  %v536_v61 = vpop.permute.xlu1 %535 }
 0x484   : > { %816 = vrcp.f32 %v476_v60  ;;  %v541_v62 = vsel %vm491_vm4, %v536_v61, 0 }
 0x485   : > { %777 = vmatpush3.bf16.msra.mxu0 %v541_v62 }
 0x487   : > { %v487_v63 = vpop.permute.xlu0 %486 }
 0x488   : > { %v493_v1 = vsel %vm491_vm4, %v487_v63, 0 }
 0x489   : > { %771 = vmatpush3.bf16.msra.mxu1 %v493_v1 }
 0x48a   : > { %v815_v2 = vpop.eup %814  ;;  %782 = vmatprep.subr.bf16.mxu1 %v826_v4 }
 0x48b   : > { %v483_v3 = vmul.f32 %v815_v2, %v811_v55 }
 0x48d   : > { %v485_v5 = vpack.c.bf16 %v483_v3, %v483_v3 }
 0x48e   : > { %v817_v6 = vpop.eup %816 }
 0x48f   : > { %v482_v7 = vmul.f32 %v817_v6, %v813_v57  ;;  %779 = vmatmul.mubr.msk.bf16.vlgmr.msra.gmra.mrb[8].mxu0 %vm461_vm3, %v485_v5 }
 0x491   : > { %v484_v8 = vpack.c.bf16 %v482_v7, %v482_v7 }
 0x493   : > { %773 = vmatmul.mubr.msk.bf16.vlgmr.msra.gmra.mrb[4].mxu1 %vm461_vm3, %v484_v8 }
 0x494   : > { %786 = vmatprep.mubr.msk.bf16.mxu1 %vm827_vm1, %v826_v4  ;;  %783 = vmatpush3.bf16.msra.mxu1 %v806_v9 }
 0x495   : > { %784 = vmatprep.subr.bf16.mxu1 %v826_v4 }
 0x498   : > { %785 = vmatpush3.bf16.msra.mxu1 %v807_v10 }
 0x562   : > { %v577_v11 = vpop.f32.mrb[8].mxu0 }
 0x563   : > { %584 = vrot.lane.b32.xlu1 %v577_v11, %s831_s24  ;;  %v780_v12 = vpop.f32.mrb[9].mxu0 }
 0x564   : > { %v580_v13 = vpop.f32.mrb[10].mxu0 }
 0x565   : > { %v781_v14 = vpop.f32.mrb[11].mxu0 }
 0x566   : > { %v529_v15 = vpop.f32.mrb[4].mxu1 }
 0x567   : > { %v774_v16 = vpop.f32.mrb[5].mxu1 }
 0x568   : > { %v532_v17 = vpop.f32.mrb[6].mxu1 }
 0x569   : > { %v775_v18 = vpop.f32.mrb[7].mxu1 }
 0x5d5   : > { %v585_v19 = vpop.permute.xlu1 %584 }
 0x5d6   : > { %v587_v20 = vsel %vm359_vm2, %v529_v15, %v585_v19 }
 0x5d7   : > { %v588_v4 = vpack.c.bf16 %v587_v20, %v587_v20 }
 0x5d9   : > { %787 = vmatmul.mubr.msk.bf16.vlgmr.msra.gmra.mrb[8].mxu1 %vm265_vm0, %v588_v4 }
 0x6ac   : > { %v642_v21 = vpop.f32.mrb[8].mxu1 }
 0x6ad   : > { %v648_v22 = vadd.f32 %v642_v21, %v883_v0  ;;  %v788_v23 = vpop.f32.mrb[9].mxu1 }
 0x6ae   : > { %v645_v24 = vpop.f32.mrb[10].mxu1 }
 0x6af   : > { %649 = vst.msk [vmem:[%s260_s27] sm:$0xff] %vm265_vm0, %v648_v22  ;;  %v789_v25 = vpop.f32.mrb[11].mxu1 }
 0x6b0 PF: > { %s16_s21 = sadd.s32 1, %s824_s21  }
 0x6b1   : > { %p13_p4 = scmp.ge.s32.totalorder %s16_s21, 4  }
 0x6b3   :  { %15 = sbr.rel (!%p13_p4) target bundleno = 1 (0x1), region = 77 }

// kernel: t5gen_forward.8
= control target key start
LH: loop header
LB: loop body
LE: loop exit
PB: predicated region body
PF: predicated region fallthrough
CT: control target
= control target key end

     0   :  { %s877_s21 = smov 0   ;;  %s974_s0 = inlined_call_operand.vmem [shape: f32[2,8,32], index: 0, kind: input, shape index: {}]   ;;  %s975_s1 = inlined_call_operand.vmem [shape: f32[1,32], index: 1, kind: input, shape index: {}]   ;;  %s976_s2 = inlined_call_operand.vmem [shape: bf16[32,96], index: 2, kind: input, shape index: {}]   ;;  %s977_s3 = inlined_call_operand.vmem [shape: bf16[32,32], index: 3, kind: input, shape index: {}]   ;;  %s978_s4 = inlined_call_operand.vmem [shape: bf16[2,8,8], index: 4, kind: input, shape index: {}]   ;;  %s979_s5 = inlined_call_operand.vmem [shape: f32[2,1,8], index: 5, kind: input, shape index: {}]   ;;  %s980_s6 = inlined_call_operand.vmem [shape: f32[2,8,32], index: 6, kind: output, shape index: {}]  }
   0x1 LB: > { %s720_s22 = sadd.s32 4294967295, %s833_s21   ;;  %p724_p0 = scmp.ge.s32.totalorder %s833_s21, 1  ;;  %s833_s21 = sphi %s877_s21, %s16_s21  }
   0x2   : > { %p219_p1 = scmp.lt.s32.totalorder %s833_s21, 3 }
   0x4   : > { %p220_p2 = pnand %p724_p0, %p219_p1 }
   0x5   : > { %p250_p3 = scmp.lt.s32.totalorder (!%p220_p2), %s720_s22, 1  ;;  %vm265_vm0 = vcmask (!%p220_p2), 261120   ;;  %v813_v3 = vld [vmem:[%s976_s2] sm:$0xff] (!%p220_p2)   ;;  %v835_v4 = vmov (!%p220_p2), 0.0   ;;  %vm836_vm1 = vmmov (!%p220_p2), 0   ;;  %v814_v5 = vld [vmem:[%s976_s2 + $0x8] sm:$0xff] (!%p220_p2)   ;;  %v351_v25 = vlaneseq (!%p220_p2) }
   0x6   : > { %223 = sbr.rel (%p220_p2) target bundleno = 1714 (0x6b2), region = 44  ;;  %758 = vmatprep.subr.bf16.mxu0 (!%p220_p2), %v835_v4  ;;  %762 = vmatprep.mubr.msk.bf16.mxu0 (!%p220_p2), %vm836_vm1, %v835_v4  ;;  %v727_v10 = vld [vmem:[%s975_s1] ss:$0 sm:$0xff] (!%p220_p2)  ;;  %s837_s9 = smov (!%p220_p2), 112   ;;  %vm359_vm2 = vcmask (!%p220_p2), 130048   ;;  %vm469_vm4 = vcmask (!%p220_p2), 64512  }
   0x7   : > { %759 = vmatpush3.bf16.msra.mxu0 (!%p220_p2), %v813_v3  ;;  %766 = vmatprep.subr.bf16.mxu1 (!%p220_p2), %v835_v4  ;;  %s838_s10 = smov (!%p220_p2), 96   ;;  %v352_v28 = vshrl.u32 (!%p220_p2), %v351_v25, 7  ;;  %v464_v31 = vand.u32 (!%p220_p2), 127, %v351_v25  ;;  %v741_v32 = vld [vmem:[%s978_s4] sm:$0xff] (!%p220_p2)   ;;  %v839_v39 = vmov (!%p220_p2), -1e+09  }
   0x8   : > { %760 = vmatprep.subr.bf16.mxu0 (!%p220_p2), %v835_v4  ;;  %768 = vmatprep.mubr.msk.bf16.mxu1 (!%p220_p2), %vm836_vm1, %v835_v4  ;;  %v743_v34 = vunpack.c.h.bf16 (!%p220_p2), %v741_v32  ;;  %v742_v43 = vunpack.c.l.bf16 (!%p220_p2), %v741_v32  ;;  %s840_s16 = smov (!%p220_p2), 64   ;;  %vm499_vm5 = vcmask (!%p220_p2), 1043456   ;;  %s841_s24 = smov (!%p220_p2), 16  }
   0x9   : > { %v353_v30 = vsub.s32 (!%p220_p2), 0, %v352_v28  ;;  %vm465_vm3 = vcmp.le.s32.totalorder (!%p220_p2), %v464_v31, %v352_v28 }
   0xa   : > { %v466_v40 = vsel (!%p220_p2), %vm465_vm3, 0.0, %v839_v39 }
   0xb   : > { %761 = vmatpush3.bf16.msra.mxu0 (!%p220_p2), %v814_v5 }
   0xc   : > { %772 = vmatprep.subr.bf16.mxu0 (!%p220_p2), %v835_v4 }
   0xd   : > { %s982_s22 = smov (!%p250_p3, %s720_s22), 1 }
   0xe   : > { %s725_s23 = sshll.u32 %s982_s22, 3  ;;  %s256_s13 = scalar_lea.vmem %s979_s5, %s982_s22 }
   0xf   : > { %s253_s26 = scalar_lea.vmem %s974_s0, %s725_s23  ;;  %v347_v26 = vld [vmem:[%s256_s13] sm:$0x1]  ;;  %s260_s27 = scalar_lea.vmem %s980_s6, %s725_s23 }
  0x10   : > { %v893_v0 = vld [vmem:[%s253_s26] sm:$0xff]  ;;  %v348_v27 = vsub.f32 1.0, %v347_v26 }
  0x11   : > { %v264_v1 = vmul.f32 %v893_v0, %v893_v0 }
  0x12   : > { %v349_v29 = vmul.f32 -1e+09, %v348_v27 }
  0x13   : > { %v266_v2 = vsel %vm265_vm0, %v264_v1, 0.0 }
  0x14   : > { %267 = vadd.xlane.f32.xlu0 %v266_v2  ;;  %v354_v33 = vrot.slane %v349_v29, %v353_v30 }
  0xa1   : > { %v268_v6 = vpop.xlane.xlu0 %267 }
  0xa2   : > { %v270_v7 = vmul.f32 0.03125, %v268_v6 }
  0xa4   : > { %v271_v8 = vadd.f32 1e-06, %v270_v7 }
  0xa6   : > { %817 = vrsqrt.f32 %v271_v8 }
  0xb0   : > { %v818_v9 = vpop.eup %817 }
  0xb1   : > { %v273_v11 = vmul.f32 %v818_v9, %v893_v0 }
  0xb3   : > { %v280_v12 = vmul.f32 %v727_v10, %v273_v11 }
  0xb5   : > { %v281_v13 = vpack.c.bf16 %v280_v12, %v280_v12 }
  0xb7   : > { %763 = vmatmul.mubr.msk.bf16.vlgmr.msra.gmra.mrb[0].mxu0 %vm265_vm0, %v281_v13 }
  0xb8   : > { %774 = vmatprep.mubr.msk.bf16.mxu0 %vm836_vm1, %v835_v4 }
 0x18a   : > { %v335_v14 = vpop.f32.mrb[0].mxu0 }
 0x18b   : > { %342 = vrot.lane.b32.xlu0 %v335_v14, %s837_s9  ;;  %v764_v15 = vpop.f32.mrb[1].mxu0  ;;  %v922_v20 = vpack.c.bf16 %v335_v14, %v335_v14  ;;  %v815_v14 = vld [vmem:[%s977_s3] sm:$0xff]  }
 0x18c   : > { %v338_v16 = vpop.f32.mrb[2].mxu0  ;;  %v816_v15 = vld [vmem:[%s977_s3 + $0x8] sm:$0xff]  }
 0x18d   : > { %v765_v17 = vpop.f32.mrb[3].mxu0 }
 0x1fd   : > { %v343_v18 = vpop.permute.xlu0 %342 }
 0x1fe   : > { %v919_v19 = vpack.c.bf16 %v343_v18, %v343_v18 }
 0x200   : > { %407 = vrot.lane.b32.xlu1 %v919_v19, %s838_s10 }
 0x204   : > { %357 = vrot.lane.b32.xlu1 %v922_v20, %s838_s10 }
 0x272   : > { %v408_v21 = vpop.permute.xlu1 %407 }
 0x273   : > { %v413_v22 = vsel %vm359_vm2, %v408_v21, 0 }
 0x274   : > { %773 = vmatpush3.bf16.xpose.msra.mxu0 %v413_v22 }
 0x275   : > { %784 = vmatprep.subr.bf16.mxu0 %v835_v4 }
 0x276   : > { %v358_v23 = vpop.permute.xlu1 %357 }
 0x277   : > { %v364_v24 = vsel %vm359_vm2, %v358_v23, 0 }
 0x278   : > { %767 = vmatpush3.bf16.xpose.msra.mxu1 %v364_v24 }
 0x279   : > { %778 = vmatprep.subr.bf16.mxu1 %v835_v4 }
 0x27b   : > { %775 = vmatmul.mubr.msk.bf16.vlgmr.msra.gmra.mrb[4].mxu0 %vm359_vm2, %v919_v19 }
 0x27c   : > { %786 = vmatprep.mubr.msk.bf16.mxu0 %vm836_vm1, %v835_v4 }
 0x27f   : > { %769 = vmatmul.mubr.msk.bf16.vlgmr.msra.gmra.mrb[0].mxu1 %vm359_vm2, %v922_v20 }
 0x280   : > { %780 = vmatprep.mubr.msk.bf16.mxu1 %vm836_vm1, %v835_v4 }
 0x34e   : > { %v449_v35 = vpop.f32.mrb[4].mxu0 }
 0x34f   : > { %v450_v36 = vadd.f32 %v449_v35, %v354_v33  ;;  %v776_v37 = vpop.f32.mrb[5].mxu0 }
 0x350   : > { %v452_v38 = vpop.f32.mrb[6].mxu0 }
 0x351   : > { %v460_v41 = vadd.f32 %v743_v34, %v450_v36  ;;  %v777_v42 = vpop.f32.mrb[7].mxu0 }
 0x352   : > { %v400_v44 = vpop.f32.mrb[0].mxu1 }
 0x353   : > { %v401_v45 = vadd.f32 %v400_v44, %v354_v33  ;;  %v770_v46 = vpop.f32.mrb[1].mxu1  ;;  %v468_v47 = vadd.f32 %v466_v40, %v460_v41 }
 0x354   : > { %v403_v48 = vpop.f32.mrb[2].mxu1 }
 0x355   : > { %v459_v49 = vadd.f32 %v742_v43, %v401_v45  ;;  %v771_v50 = vpop.f32.mrb[3].mxu1  ;;  %v473_v51 = vsel %vm469_vm4, %v468_v47, -inf }
 0x356   : > { %474 = vmax.xlane.f32.xlu1 %v473_v51 }
 0x357   : > { %v467_v52 = vadd.f32 %v466_v40, %v459_v49 }
 0x359   : > { %v470_v53 = vsel %vm469_vm4, %v467_v52, -inf }
 0x35a   : > { %471 = vmax.xlane.f32.xlu0 %v470_v53 }
 0x3e3   : > { %v475_v54 = vpop.xlane.xlu1 %474 }
 0x3e4   : > { %v477_v55 = vsub.f32 %v468_v47, %v475_v54 }
 0x3e6   : > { %v480_v56 = vmul.f32 1.442695, %v477_v55 }
 0x3e7   : > { %v472_v57 = vpop.xlane.xlu0 %471 }
 0x3e8   : > { %819 = vpow2.f32 %v480_v56  ;;  %v476_v58 = vsub.f32 %v467_v52, %v472_v57 }
 0x3ea   : > { %v478_v59 = vmul.f32 1.442695, %v476_v58 }
 0x3ec   : > { %821 = vpow2.f32 %v478_v59 }
 0x3f2   : > { %v820_v60 = vpop.eup %819 }
 0x3f3   : > { %v485_v61 = vsel %vm469_vm4, %v820_v60, 0.0 }
 0x3f4   : > { %486 = vadd.xlane.f32.xlu1 %v485_v61 }
 0x3f6   : > { %v822_v62 = vpop.eup %821 }
 0x3f7   : > { %v482_v63 = vsel %vm469_vm4, %v822_v62, 0.0 }
 0x3f8   : > { %483 = vadd.xlane.f32.xlu0 %v482_v63 }
 0x405   : > { %543 = vrot.lane.b32.xlu1 %v919_v19, %s840_s16 }
 0x40e   : > { %494 = vrot.lane.b32.xlu0 %v922_v20, %s840_s16 }
 0x481   : > { %v487_v1 = vpop.xlane.xlu1 %486 }
 0x482   : > { %823 = vrcp.f32 %v487_v1 }
 0x485   : > { %v484_v2 = vpop.xlane.xlu0 %483  ;;  %v544_v3 = vpop.permute.xlu1 %543 }
 0x486   : > { %825 = vrcp.f32 %v484_v2  ;;  %v549_v5 = vsel %vm499_vm5, %v544_v3, 0 }
 0x487   : > { %785 = vmatpush3.bf16.msra.mxu0 %v549_v5 }
 0x489   : > { %v495_v6 = vpop.permute.xlu0 %494 }
 0x48a   : > { %v501_v7 = vsel %vm499_vm5, %v495_v6, 0 }
 0x48b   : > { %779 = vmatpush3.bf16.msra.mxu1 %v501_v7 }
 0x48c   : > { %v824_v8 = vpop.eup %823  ;;  %790 = vmatprep.subr.bf16.mxu1 %v835_v4 }
 0x48d   : > { %v491_v9 = vmul.f32 %v824_v8, %v820_v60 }
 0x48f   : > { %v493_v10 = vpack.c.bf16 %v491_v9, %v491_v9 }
 0x490   : > { %v826_v11 = vpop.eup %825 }
 0x491   : > { %v490_v12 = vmul.f32 %v826_v11, %v822_v62  ;;  %787 = vmatmul.mubr.msk.bf16.vlgmr.msra.gmra.mrb[8].mxu0 %vm469_vm4, %v493_v10 }
 0x493   : > { %v492_v13 = vpack.c.bf16 %v490_v12, %v490_v12 }
 0x495   : > { %781 = vmatmul.mubr.msk.bf16.vlgmr.msra.gmra.mrb[4].mxu1 %vm469_vm4, %v492_v13 }
 0x496   : > { %794 = vmatprep.mubr.msk.bf16.mxu1 %vm836_vm1, %v835_v4  ;;  %791 = vmatpush3.bf16.msra.mxu1 %v815_v14 }
 0x497   : > { %792 = vmatprep.subr.bf16.mxu1 %v835_v4 }
 0x49a   : > { %793 = vmatpush3.bf16.msra.mxu1 %v816_v15 }
 0x564   : > { %v585_v16 = vpop.f32.mrb[8].mxu0 }
 0x565   : > { %592 = vrot.lane.b32.xlu1 %v585_v16, %s841_s24  ;;  %v788_v17 = vpop.f32.mrb[9].mxu0 }
 0x566   : > { %v588_v18 = vpop.f32.mrb[10].mxu0 }
 0x567   : > { %v789_v19 = vpop.f32.mrb[11].mxu0 }
 0x568   : > { %v537_v20 = vpop.f32.mrb[4].mxu1 }
 0x569   : > { %v782_v21 = vpop.f32.mrb[5].mxu1 }
 0x56a   : > { %v540_v22 = vpop.f32.mrb[6].mxu1 }
 0x56b   : > { %v783_v23 = vpop.f32.mrb[7].mxu1 }
 0x5d7   : > { %v593_v24 = vpop.permute.xlu1 %592 }
 0x5d8   : > { %v595_v25 = vsel %vm359_vm2, %v537_v20, %v593_v24 }
 0x5d9   : > { %v596_v4 = vpack.c.bf16 %v595_v25, %v595_v25 }
 0x5db   : > { %795 = vmatmul.mubr.msk.bf16.vlgmr.msra.gmra.mrb[8].mxu1 %vm265_vm0, %v596_v4 }
 0x6ae   : > { %v650_v26 = vpop.f32.mrb[8].mxu1 }
 0x6af   : > { %v656_v27 = vadd.f32 %v650_v26, %v893_v0  ;;  %v796_v28 = vpop.f32.mrb[9].mxu1 }
 0x6b0   : > { %v653_v29 = vpop.f32.mrb[10].mxu1 }
 0x6b1   : > { %657 = vst.msk [vmem:[%s260_s27] sm:$0xff] %vm265_vm0, %v656_v27  ;;  %v797_v30 = vpop.f32.mrb[11].mxu1 }
 0x6b2 PF: > { %s16_s21 = sadd.s32 1, %s833_s21  }
 0x6b3   : > { %p13_p4 = scmp.ge.s32.totalorder %s16_s21, 4  }
 0x6b5   :  { %15 = sbr.rel (!%p13_p4) target bundleno = 1 (0x1), region = 77 }

// kernel: t5gen_forward.9
= control target key start
LH: loop header
LB: loop body
LE: loop exit
PB: predicated region body
PF: predicated region fallthrough
CT: control target
= control target key end

     0   :  { %s950_s21 = smov 0   ;;  %s1047_s0 = inlined_call_operand.vmem [shape: f32[2,8,32], index: 0, kind: input, shape index: {}]   ;;  %s1048_s1 = inlined_call_operand.vmem [shape: f32[2,8,32], index: 1, kind: input, shape index: {}]   ;;  %s1049_s2 = inlined_call_operand.vmem [shape: f32[1,32], index: 2, kind: input, shape index: {}]   ;;  %s1050_s3 = inlined_call_operand.vmem [shape: bf16[32,96], index: 3, kind: input, shape index: {}]   ;;  %s1051_s4 = inlined_call_operand.vmem [shape: bf16[32,32], index: 4, kind: input, shape index: {}]   ;;  %s1052_s5 = inlined_call_operand.vmem [shape: f32[2,1,8], index: 5, kind: input, shape index: {}]   ;;  %s1053_s6 = inlined_call_operand.vmem [shape: f32[2,8,32], index: 6, kind: output, shape index: {}]  }
   0x1 LB: > { %s788_s22 = sadd.s32 4294967295, %s908_s21   ;;  %p792_p0 = scmp.ge.s32.totalorder %s908_s21, 1  ;;  %s908_s21 = sphi %s950_s21, %s16_s21  }
   0x2   : > { %p228_p1 = scmp.lt.s32.totalorder %s908_s21, 3 }
   0x4   : > { %p229_p2 = pnand %p792_p0, %p228_p1 }
   0x5   : > { %p263_p3 = scmp.lt.s32.totalorder (!%p229_p2), %s788_s22, 1  ;;  %v889_v0 = vld [vmem:[%s1050_s3 + $0x8] sm:$0xff] (!%p229_p2)   ;;  %s910_s26 = smov (!%p229_p2), 96   ;;  %vm282_vm0 = vcmask (!%p229_p2), 261120   ;;  %v888_v4 = vld [vmem:[%s1050_s3] sm:$0xff] (!%p229_p2)   ;;  %v911_v5 = vmov (!%p229_p2), 0.0   ;;  %v425_v34 = vlaneseq (!%p229_p2) }
   0x6   : > { %232 = sbr.rel (%p229_p2) target bundleno = 1587 (0x633), region = 44  ;;  %362 = vrot.lane.b32.xlu1 (!%p229_p2), %v889_v0, %s910_s26  ;;  %835 = vmatprep.subr.bf16.mxu1 (!%p229_p2), %v911_v5  ;;  %vm912_vm1 = vmmov (!%p229_p2), 0   ;;  %v796_v14 = vld [vmem:[%s1049_s2] ss:$0 sm:$0xff] (!%p229_p2)  ;;  %vm430_vm2 = vcmask (!%p229_p2), 130048   ;;  %s913_s13 = smov (!%p229_p2), 112  }
   0x7   : > { %827 = vmatprep.subr.bf16.mxu0 (!%p229_p2), %v911_v5  ;;  %839 = vmatprep.mubr.msk.bf16.mxu1 (!%p229_p2), %vm912_vm1, %v911_v5  ;;  %v426_v37 = vshrl.u32 (!%p229_p2), %v425_v34, 7  ;;  %vm523_vm3 = vcmask (!%p229_p2), 64512   ;;  %vm554_vm4 = vcmask (!%p229_p2), 1043456  }
   0x8   : > { %828 = vmatpush3.bf16.msra.mxu0 (!%p229_p2), %v888_v4  ;;  %831 = vmatprep.mubr.msk.bf16.mxu0 (!%p229_p2), %vm912_vm1, %v911_v5 }
   0x9   : > { %829 = vmatprep.subr.bf16.mxu0 (!%p229_p2), %v911_v5  ;;  %v427_v39 = vsub.s32 (!%p229_p2), 0, %v426_v37 }
   0xc   : > { %830 = vmatpush3.bf16.msra.mxu0 (!%p229_p2), %v889_v0 }
   0xd   : > { %s1055_s22 = smov (!%p263_p3, %s788_s22), 1  ;;  %843 = vmatprep.subr.bf16.mxu0 %v911_v5 }
   0xe   : > { %s964_s25 = sshll.u32 %s1055_s22, 3  ;;  %s273_s16 = scalar_lea.vmem %s1052_s5, %s1055_s22 }
   0xf   : > { %s266_s29 = scalar_lea.vmem %s1047_s0, %s964_s25  ;;  %s270_s10 = scalar_lea.vmem %s1048_s1, %s964_s25  ;;  %v421_v35 = vld [vmem:[%s273_s16] sm:$0x1] }
  0x10   : > { %v971_v1 = vld [vmem:[%s266_s29] sm:$0xff]  ;;  %v422_v36 = vsub.f32 1.0, %v421_v35  ;;  %s914_s22 = smov 16  }
  0x11   : > { %v281_v2 = vmul.f32 %v971_v1, %v971_v1  ;;  %v303_v10 = vld [vmem:[%s270_s10] sm:$0xff] }
  0x12   : > { %v304_v12 = vpack.c.bf16 %v303_v10, %v303_v10  ;;  %v423_v38 = vmul.f32 -1e+09, %v422_v36 }
  0x13   : > { %v283_v3 = vsel %vm282_vm0, %v281_v2, 0.0 }
  0x14   : > { %284 = vadd.xlane.f32.xlu0 %v283_v3  ;;  %v428_v40 = vrot.slane %v423_v38, %v427_v39 }
  0x2a   : > { %360 = vrot.lane.b32.xlu0 %v888_v4, %s910_s26 }
  0x78   : > { %v363_v11 = vpop.permute.xlu1 %362 }
  0xa1   : > { %v285_v6 = vpop.xlane.xlu0 %284 }
  0xa2   : > { %v287_v7 = vmul.f32 0.03125, %v285_v6 }
  0xa4   : > { %v288_v8 = vadd.f32 1e-06, %v287_v7 }
  0xa5   : > { %v361_v9 = vpop.permute.xlu0 %360 }
  0xa6   : > { %892 = vrsqrt.f32 %v288_v8  ;;  %836 = vmatpush3.bf16.msra.mxu1 %v361_v9 }
  0xa7   : > { %837 = vmatprep.subr.bf16.mxu1 %v911_v5 }
  0xaa   : > { %838 = vmatpush3.bf16.msra.mxu1 %v363_v11 }
  0xab   : > { %849 = vmatprep.subr.bf16.mxu1 %v911_v5 }
  0xad   : > { %840 = vmatmul.mubr.msk.bf16.vlgmr.msra.gmra.mrb[0].mxu1 %vm282_vm0, %v304_v12 }
  0xae   : > { %851 = vmatprep.mubr.msk.bf16.mxu1 %vm912_vm1, %v911_v5 }
  0xb0   : > { %v893_v13 = vpop.eup %892 }
  0xb1   : > { %v290_v15 = vmul.f32 %v893_v13, %v971_v1  ;;  %v890_v13 = vld [vmem:[%s1051_s4] sm:$0xff]  }
  0xb3   : > { %v297_v16 = vmul.f32 %v796_v14, %v290_v15  ;;  %v891_v14 = vld [vmem:[%s1051_s4 + $0x8] sm:$0xff]  }
  0xb5   : > { %v298_v17 = vpack.c.bf16 %v297_v16, %v297_v16 }
  0xb7   : > { %832 = vmatmul.mubr.msk.bf16.vlgmr.msra.gmra.mrb[0].mxu0 %vm282_vm0, %v298_v17 }
  0xb8   : > { %845 = vmatprep.mubr.msk.bf16.mxu0 %vm912_vm1, %v911_v5 }
 0x180   : > { %v403_v18 = vpop.f32.mrb[0].mxu1 }
 0x181   : > { %v419_v19 = vpack.c.bf16 %v403_v18, %v403_v18  ;;  %v841_v20 = vpop.f32.mrb[1].mxu1  ;;  %416 = vrot.lane.b32.xlu1 %v403_v18, %s913_s13 }
 0x182   : > { %v406_v21 = vpop.f32.mrb[2].mxu1 }
 0x183   : > { %v842_v22 = vpop.f32.mrb[3].mxu1  ;;  %v435_v23 = vsel %vm430_vm2, %v419_v19, 0 }
 0x184   : > { %844 = vmatpush3.bf16.xpose.msra.mxu0 %v435_v23 }
 0x185   : > { %855 = vmatprep.subr.bf16.mxu0 %v911_v5 }
 0x18a   : > { %v354_v24 = vpop.f32.mrb[0].mxu0 }
 0x18b   : > { %v413_v25 = vpack.c.bf16 %v354_v24, %v354_v24  ;;  %v833_v26 = vpop.f32.mrb[1].mxu0  ;;  %410 = vrot.lane.b32.xlu1 %v354_v24, %s913_s13 }
 0x18c   : > { %v357_v27 = vpop.f32.mrb[2].mxu0 }
 0x18d   : > { %v834_v28 = vpop.f32.mrb[3].mxu0  ;;  %846 = vmatmul.mubr.msk.bf16.vlgmr.msra.gmra.mrb[4].mxu0 %vm430_vm2, %v413_v25 }
 0x18e   : > { %857 = vmatprep.mubr.msk.bf16.mxu0 %vm912_vm1, %v911_v5 }
 0x1f3   : > { %v417_v29 = vpop.permute.xlu1 %416 }
 0x1f4   : > { %v420_v30 = vpack.c.bf16 %v417_v29, %v417_v29 }
 0x1f6   : > { %v481_v31 = vsel %vm430_vm2, %v420_v30, 0 }
 0x1f7   : > { %850 = vmatpush3.bf16.xpose.msra.mxu1 %v481_v31 }
 0x1f8   : > { %861 = vmatprep.subr.bf16.mxu1 %v911_v5 }
 0x1fd   : > { %v411_v32 = vpop.permute.xlu1 %410 }
 0x1fe   : > { %v414_v33 = vpack.c.bf16 %v411_v32, %v411_v32 }
 0x200   : > { %852 = vmatmul.mubr.msk.bf16.vlgmr.msra.gmra.mrb[4].mxu1 %vm430_vm2, %v414_v33 }
 0x201   : > { %863 = vmatprep.mubr.msk.bf16.mxu1 %vm912_vm1, %v911_v5 }
 0x260   : > { %v471_v41 = vpop.f32.mrb[4].mxu0 }
 0x261   : > { %v472_v42 = vadd.f32 %v471_v41, %v428_v40  ;;  %v847_v43 = vpop.f32.mrb[5].mxu0 }
 0x262   : > { %v474_v44 = vpop.f32.mrb[6].mxu0 }
 0x263   : > { %v848_v45 = vpop.f32.mrb[7].mxu0  ;;  %v524_v46 = vsel %vm523_vm3, %v472_v42, -inf }
 0x264   : > { %525 = vmax.xlane.f32.xlu0 %v524_v46 }
 0x2d3   : > { %v517_v47 = vpop.f32.mrb[4].mxu1 }
 0x2d4   : > { %v518_v48 = vadd.f32 %v517_v47, %v428_v40  ;;  %v853_v49 = vpop.f32.mrb[5].mxu1 }
 0x2d5   : > { %v520_v50 = vpop.f32.mrb[6].mxu1 }
 0x2d6   : > { %v854_v51 = vpop.f32.mrb[7].mxu1  ;;  %v527_v52 = vsel %vm523_vm3, %v518_v48, -inf }
 0x2d7   : > { %528 = vmax.xlane.f32.xlu1 %v527_v52 }
 0x2f1   : > { %v526_v53 = vpop.xlane.xlu0 %525 }
 0x2f2   : > { %v530_v54 = vsub.f32 %v472_v42, %v526_v53 }
 0x2f4   : > { %v532_v55 = vmul.f32 1.442695, %v530_v54 }
 0x2f6   : > { %894 = vpow2.f32 %v532_v55 }
 0x300   : > { %v895_v56 = vpop.eup %894 }
 0x301   : > { %v536_v57 = vsel %vm523_vm3, %v895_v56, 0.0 }
 0x302   : > { %537 = vadd.xlane.f32.xlu0 %v536_v57 }
 0x318   : > { %549 = vrot.lane.b32.xlu0 %v419_v19, %s910_s26 }
 0x364   : > { %v529_v58 = vpop.xlane.xlu1 %528 }
 0x365   : > { %v531_v59 = vsub.f32 %v518_v48, %v529_v58 }
 0x367   : > { %v534_v60 = vmul.f32 1.442695, %v531_v59 }
 0x369   : > { %896 = vpow2.f32 %v534_v60 }
 0x373   : > { %v897_v61 = vpop.eup %896 }
 0x374   : > { %v539_v62 = vsel %vm523_vm3, %v897_v61, 0.0 }
 0x375   : > { %540 = vadd.xlane.f32.xlu1 %v539_v62 }
 0x386   : > { %599 = vrot.lane.b32.xlu1 %v420_v30, %s910_s26  ;;  %s277_s26 = scalar_lea.vmem %s1053_s6, %s964_s25 }
 0x38f   : > { %v538_v63 = vpop.xlane.xlu0 %537 }
 0x390   : > { %898 = vrcp.f32 %v538_v63 }
 0x393   : > { %v550_v0 = vpop.permute.xlu0 %549 }
 0x394   : > { %v556_v2 = vsel %vm554_vm4, %v550_v0, 0 }
 0x395   : > { %856 = vmatpush3.bf16.msra.mxu0 %v556_v2 }
 0x396   : > { %867 = vmatprep.subr.bf16.mxu0 %v911_v5 }
 0x39a   : > { %v899_v3 = vpop.eup %898 }
 0x39b   : > { %v544_v4 = vmul.f32 %v899_v3, %v895_v56 }
 0x39d   : > { %v546_v6 = vpack.c.bf16 %v544_v4, %v544_v4 }
 0x39f   : > { %858 = vmatmul.mubr.msk.bf16.vlgmr.msra.gmra.mrb[8].mxu0 %vm523_vm3, %v546_v6 }
 0x3a0   : > { %871 = vmatprep.mubr.msk.bf16.mxu0 %vm912_vm1, %v911_v5  ;;  %868 = vmatpush3.bf16.msra.mxu0 %v890_v13 }
 0x3a1   : > { %869 = vmatprep.subr.bf16.mxu0 %v911_v5 }
 0x3a4   : > { %870 = vmatpush3.bf16.msra.mxu0 %v891_v14 }
 0x402   : > { %v541_v7 = vpop.xlane.xlu1 %540 }
 0x403   : > { %900 = vrcp.f32 %v541_v7 }
 0x406   : > { %v600_v8 = vpop.permute.xlu1 %599 }
 0x407   : > { %v605_v9 = vsel %vm554_vm4, %v600_v8, 0 }
 0x408   : > { %862 = vmatpush3.bf16.msra.mxu1 %v605_v9 }
 0x40d   : > { %v901_v10 = vpop.eup %900 }
 0x40e   : > { %v545_v11 = vmul.f32 %v901_v10, %v897_v61 }
 0x410   : > { %v547_v12 = vpack.c.bf16 %v545_v11, %v545_v11 }
 0x412   : > { %864 = vmatmul.mubr.msk.bf16.vlgmr.msra.gmra.mrb[8].mxu1 %vm523_vm3, %v547_v12 }
 0x472   : > { %v592_v15 = vpop.f32.mrb[8].mxu0 }
 0x473   : > { %v859_v16 = vpop.f32.mrb[9].mxu0 }
 0x474   : > { %v595_v17 = vpop.f32.mrb[10].mxu0 }
 0x475   : > { %v860_v18 = vpop.f32.mrb[11].mxu0 }
 0x4e5   : > { %v641_v19 = vpop.f32.mrb[8].mxu1 }
 0x4e6   : > { %648 = vrot.lane.b32.xlu1 %v641_v19, %s914_s22  ;;  %v865_v20 = vpop.f32.mrb[9].mxu1 }
 0x4e7   : > { %v644_v21 = vpop.f32.mrb[10].mxu1 }
 0x4e8   : > { %v866_v22 = vpop.f32.mrb[11].mxu1 }
 0x558   : > { %v649_v23 = vpop.permute.xlu1 %648 }
 0x559   : > { %v651_v24 = vsel %vm430_vm2, %v592_v15, %v649_v23 }
 0x55a   : > { %v652_v25 = vpack.c.bf16 %v651_v24, %v651_v24 }
 0x55c   : > { %872 = vmatmul.mubr.msk.bf16.vlgmr.msra.gmra.mrb[12].mxu0 %vm282_vm0, %v652_v25 }
 0x62f   : > { %v706_v5 = vpop.f32.mrb[12].mxu0 }
 0x630   : > { %v712_v26 = vadd.f32 %v706_v5, %v971_v1  ;;  %v873_v27 = vpop.f32.mrb[13].mxu0 }
 0x631   : > { %v709_v28 = vpop.f32.mrb[14].mxu0 }
 0x632   : > { %713 = vst.msk [vmem:[%s277_s26] sm:$0xff] %vm282_vm0, %v712_v26  ;;  %v874_v29 = vpop.f32.mrb[15].mxu0 }
 0x633 PF: > { %s16_s21 = sadd.s32 1, %s908_s21  }
 0x634   : > { %p13_p4 = scmp.ge.s32.totalorder %s16_s21, 4  }
 0x636   :  { %15 = sbr.rel (!%p13_p4) target bundleno = 1 (0x1), region = 80 }

// kernel: t5gen_forward.10
= control target key start
LH: loop header
LB: loop body
LE: loop exit
PB: predicated region body
PF: predicated region fallthrough
CT: control target
= control target key end

     0   :  { %vm26_vm0 = vcmask 261120   ;;  %v248_v6 = vmov 0.0   ;;  %vm249_vm1 = vmmov 0   ;;  %vm146_vm2 = vcmask 523264   ;;  %s324_s0 = inlined_call_operand.vmem [shape: f32[16,32], index: 0, kind: input, shape index: {}]   ;;  %s325_s4 = inlined_call_operand.vmem [shape: f32[1,32], index: 4, kind: input, shape index: {}]   ;;  %s326_s2 = inlined_call_operand.vmem [shape: bf16[32,64], index: 2, kind: input, shape index: {}]   ;;  %s327_s3 = inlined_call_operand.vmem [shape: bf16[64,32], index: 3, kind: input, shape index: {}]   ;;  %s328_s1 = inlined_call_operand.vmem [shape: f32[1,32], index: 1, kind: input, shape index: {}]   ;;  %s329_s5 = inlined_call_operand.vmem [shape: f32[16,32], index: 5, kind: output, shape index: {}]  }
   0x1   :  { %v21_v0 = vld [vmem:[%s324_s0] sm:$0xff]  ;;  %v286_v1 = vld [vmem:[%s324_s0 + $0x8] sm:$0xff]  ;;  %216 = vmatprep.subr.bf16.mxu0 %v248_v6  ;;  %220 = vmatprep.mubr.msk.bf16.mxu0 %vm249_vm1, %v248_v6  ;;  %v242_v25 = vld [vmem:[%s327_s3 + $0x10] sm:$0xff]  }
   0x2   :  { %v24_v2 = vmul.f32 %v21_v0, %v21_v0  ;;  %v25_v3 = vmul.f32 %v286_v1, %v286_v1  ;;  %v238_v7 = vld [vmem:[%s326_s2] sm:$0xff]   ;;  %224 = vmatprep.subr.bf16.mxu1 %v248_v6  ;;  %232 = vmatprep.mubr.msk.bf16.mxu1 %vm249_vm1, %v248_v6  ;;  %v239_v8 = vld [vmem:[%s326_s2 + $0x8] sm:$0xff]   ;;  %v243_v26 = vld [vmem:[%s327_s3 + $0x18] sm:$0xff]  }
   0x3   :  { %217 = vmatpush3.bf16.msra.mxu0 %v238_v7  ;;  %v240_v9 = vld [vmem:[%s327_s3] sm:$0xff]   ;;  %v241_v10 = vld [vmem:[%s327_s3 + $0x8] sm:$0xff]  }
   0x4   :  { %v27_v4 = vsel %vm26_vm0, %v24_v2, 0.0  ;;  %v30_v5 = vsel %vm26_vm0, %v25_v3, 0.0  ;;  %218 = vmatprep.subr.bf16.mxu0 %v248_v6  ;;  %225 = vmatpush3.bf16.msra.mxu1 %v240_v9  ;;  %v199_v20 = vld [vmem:[%s328_s1] ss:$0 sm:$0xff] }
   0x5   :  { %28 = vadd.xlane.f32.xlu0 %v27_v4  ;;  %226 = vmatprep.subr.bf16.mxu1 %v248_v6 }
   0x7   :  { %219 = vmatpush3.bf16.msra.mxu0 %v239_v8 }
   0x8   :  { %227 = vmatpush3.bf16.msra.mxu1 %v241_v10 }
   0x9   :  { %31 = vadd.xlane.f32.xlu0 %v30_v5  ;;  %228 = vmatprep.subr.bf16.mxu1 %v248_v6 }
   0xc   :  { %229 = vmatpush3.bf16.msra.mxu1 %v242_v25 }
   0xd   :  { %230 = vmatprep.subr.bf16.mxu1 %v248_v6 }
  0x10   :  { %231 = vmatpush3.bf16.msra.mxu1 %v243_v26 }
  0x92   :  { %v29_v11 = vpop.xlane.xlu0 %28 }
  0x93   :  { %v34_v12 = vmul.f32 0.03125, %v29_v11 }
  0x95   :  { %v36_v13 = vadd.f32 1e-06, %v34_v12 }
  0x96   :  { %v32_v14 = vpop.xlane.xlu0 %31 }
  0x97   :  { %244 = vrsqrt.f32 %v36_v13  ;;  %v35_v15 = vmul.f32 0.03125, %v32_v14 }
  0x99   :  { %v37_v16 = vadd.f32 1e-06, %v35_v15 }
  0x9b   :  { %246 = vrsqrt.f32 %v37_v16 }
  0xa1   :  { %v245_v17 = vpop.eup %244 }
  0xa2   :  { %v40_v18 = vmul.f32 %v245_v17, %v21_v0 }
  0xa4   :  { %v48_v22 = vmul.f32 %v199_v20, %v40_v18 }
  0xa5   :  { %v247_v19 = vpop.eup %246 }
  0xa6   :  { %v41_v21 = vmul.f32 %v247_v19, %v286_v1 }
  0xa8   :  { %v49_v23 = vmul.f32 %v199_v20, %v41_v21 }
  0xaa   :  { %v50_v24 = vpack.c.bf16 %v49_v23, %v48_v22 }
  0xac   :  { %221 = vmatmul.mubr.msk.bf16.vlgmr.msra.gmra.mrb[0].mxu0 %vm26_vm0, %v50_v24 }
 0x17f   :  { %v104_v27 = vpop.f32.mrb[0].mxu0 }
 0x180   :  { %v222_v28 = vpop.f32.mrb[1].mxu0  ;;  %v111_v30 = vmax.f32 %v104_v27, 0.0 }
 0x181   :  { %v107_v29 = vpop.f32.mrb[2].mxu0 }
 0x182   :  { %v112_v31 = vmax.f32 %v107_v29, 0.0  ;;  %v223_v32 = vpop.f32.mrb[3].mxu0 }
 0x184   :  { %v113_v33 = vpack.c.bf16 %v112_v31, %v111_v30 }
 0x186   :  { %233 = vmatmul.mubr.msk.bf16.vlgmr.msra.gmra.mrb[0].mxu1 %vm146_vm2, %v113_v33 }
 0x259   :  { %v184_v34 = vpop.f32.mrb[0].mxu1 }
 0x25a   :  { %v191_v35 = vadd.f32 %v184_v34, %v21_v0  ;;  %v234_v36 = vpop.f32.mrb[1].mxu1 }
 0x25b   :  { %v187_v37 = vpop.f32.mrb[2].mxu1 }
 0x25c   :  { %193 = vst.msk [vmem:[%s329_s5] sm:$0xff] %vm26_vm0, %v191_v35  ;;  %v192_v38 = vadd.f32 %v187_v37, %v286_v1  ;;  %v235_v39 = vpop.f32.mrb[3].mxu1 }
 0x25e   :  { %194 = vst.msk [vmem:[%s329_s5 + $0x8] sm:$0xff] %vm26_vm0, %v192_v38 }

// kernel: t5gen_forward.11
= control target key start
LH: loop header
LB: loop body
LE: loop exit
PB: predicated region body
PF: predicated region fallthrough
CT: control target
= control target key end

     0   :  { %vm27_vm0 = vcmask 261120   ;;  %v368_v2 = vmov 0.0   ;;  %vm369_vm1 = vmmov 0   ;;  %vm55_vm2 = vcmask 7168   ;;  %s493_s0 = inlined_call_operand.vmem [shape: f32[16,32], index: 0, kind: input, shape index: {}]   ;;  %s494_s2 = inlined_call_operand.vmem [shape: bf16[128,32], index: 2, kind: input, shape index: {}]   ;;  %s495_s1 = inlined_call_operand.vmem [shape: f32[1,32], index: 1, kind: input, shape index: {}]   ;;  %s496_s3 = inlined_call_operand.vmem [shape: s32[16,1], index: 3, kind: input, shape index: {}]   ;;  %s497_s4 = inlined_call_operand.vmem [shape: f32[16,1], index: 4, kind: output, shape index: {}]  }
   0x1   :  { %v22_v0 = vld [vmem:[%s493_s0] sm:$0xff]  ;;  %v23_v1 = vld [vmem:[%s493_s0 + $0x8] sm:$0xff]  ;;  %318 = vmatprep.subr.bf16.mxu0 %v368_v2  ;;  %v346_v11 = vld [vmem:[%s494_s2 + $0x10] sm:$0xff]   ;;  %334 = vmatprep.mubr.msk.bf16.mxu0 %vm369_vm1, %v368_v2  ;;  %v370_v40 = vmov -1e+30   ;;  %58 = vst.msk [vmem:[#allocation4] sm:$0xff] %vm55_vm2, %v368_v2  ;;  %v190_v60 = vlaneseq }
   0x2   :  { %v25_v3 = vmul.f32 %v22_v0, %v22_v0  ;;  %v26_v4 = vmul.f32 %v23_v1, %v23_v1  ;;  %v344_v5 = vld [vmem:[%s494_s2] sm:$0xff]   ;;  %v345_v9 = vld [vmem:[%s494_s2 + $0x8] sm:$0xff]   ;;  %v130_v12 = vsel %vm27_vm0, %v346_v11, 0  ;;  %v347_v13 = vld [vmem:[%s494_s2 + $0x18] sm:$0xff]   ;;  %56 = vst.msk [vmem:[#allocation3] sm:$0xff] %vm55_vm2, %v370_v40  ;;  %v371_v45 = vmov 0  }
   0x3   :  { %v124_v7 = vsel %vm27_vm0, %v344_v5, 0  ;;  %v127_v10 = vsel %vm27_vm0, %v345_v9, 0  ;;  %v133_v14 = vsel %vm27_vm0, %v347_v13, 0  ;;  %v348_v15 = vld [vmem:[%s494_s2 + $0x20] sm:$0xff]   ;;  %v349_v17 = vld [vmem:[%s494_s2 + $0x28] sm:$0xff]   ;;  %v350_v19 = vld [vmem:[%s494_s2 + $0x30] sm:$0xff]   ;;  %342 = vset.pattern.permute.xlu0 %v371_v45  ;;  %343 = vset.pattern.permute.xlu1 %v371_v45 }
   0x4   :  { %v28_v6 = vsel %vm27_vm0, %v25_v3, 0.0  ;;  %319 = vmatpush3.bf16.xpose.msra.mxu0 %v124_v7  ;;  %v31_v8 = vsel %vm27_vm0, %v26_v4, 0.0  ;;  %v136_v16 = vsel %vm27_vm0, %v348_v15, 0  ;;  %v139_v18 = vsel %vm27_vm0, %v349_v17, 0  ;;  %v351_v21 = vld [vmem:[%s494_s2 + $0x38] sm:$0xff]   ;;  %57 = vst.msk [vmem:[#allocation3 + $0x8] sm:$0xff] %vm55_vm2, %v370_v40 }
   0x5   :  { %29 = vadd.xlane.f32.xlu0 %v28_v6  ;;  %320 = vmatprep.subr.bf16.mxu0 %v368_v2  ;;  %v142_v20 = vsel %vm27_vm0, %v350_v19, 0  ;;  %v145_v22 = vsel %vm27_vm0, %v351_v21, 0  ;;  %v295_v31 = vld [vmem:[%s495_s1] ss:$0 sm:$0xff]  ;;  %59 = vst.msk [vmem:[#allocation4 + $0x8] sm:$0xff] %vm55_vm2, %v368_v2  ;;  %60 = vst.msk [vmem:[#allocation5] sm:$0xff] %vm55_vm2, %v368_v2 }
   0x6   :  { %61 = vst.msk [vmem:[#allocation5 + $0x8] sm:$0xff] %vm55_vm2, %v368_v2  ;;  %v466_v54 = vld [vmem:[%s496_s3] sm:$0xff]  ;;  %v472_v55 = vld [vmem:[%s496_s3 + $0x8] sm:$0xff]  ;;  %v191_v63 = vand.u32 127, %v190_v60 }
   0x7   :  { %vm267_vm5 = vcmp.ne.s32.totalorder %v466_v54, 4294967196  ;;  %vm268_vm6 = vcmp.ne.s32.totalorder %v472_v55, 4294967196 }
   0x9   :  { %32 = vadd.xlane.f32.xlu0 %v31_v8  ;;  %v224_v46 = vld [vmem:[#allocation3] sm:$0xff] }
   0xb   :  { %v225_v49 = vld [vmem:[#allocation3 + $0x8] sm:$0xff] }
   0xc   :  { %321 = vmatpush3.bf16.xpose.msra.mxu0 %v127_v10 }
   0xd   :  { %322 = vmatprep.subr.bf16.mxu0 %v368_v2 }
  0x14   :  { %323 = vmatpush3.bf16.xpose.msra.mxu0 %v130_v12  ;;  %v228_v12 = vld [vmem:[#allocation4] sm:$0xff] }
  0x15   :  { %324 = vmatprep.subr.bf16.mxu0 %v368_v2 }
  0x1c   :  { %325 = vmatpush3.bf16.xpose.msra.mxu0 %v133_v14 }
  0x1d   :  { %326 = vmatprep.subr.bf16.mxu0 %v368_v2 }
  0x24   :  { %327 = vmatpush3.bf16.xpose.msra.mxu0 %v136_v16  ;;  %v229_v16 = vld [vmem:[#allocation4 + $0x8] sm:$0xff] }
  0x25   :  { %328 = vmatprep.subr.bf16.mxu0 %v368_v2 }
  0x2c   :  { %329 = vmatpush3.bf16.xpose.msra.mxu0 %v139_v18  ;;  %v207_v18 = vld [vmem:[#allocation5] sm:$0xff] }
  0x2d   :  { %330 = vmatprep.subr.bf16.mxu0 %v368_v2 }
  0x34   :  { %331 = vmatpush3.bf16.xpose.msra.mxu0 %v142_v20 }
  0x35   :  { %332 = vmatprep.subr.bf16.mxu0 %v368_v2 }
  0x3c   :  { %333 = vmatpush3.bf16.xpose.msra.mxu0 %v145_v22 }
  0x92   :  { %v30_v23 = vpop.xlane.xlu0 %29 }
  0x93   :  { %v35_v24 = vmul.f32 0.03125, %v30_v23 }
  0x95   :  { %v37_v25 = vadd.f32 1e-06, %v35_v24  ;;  %v208_v24 = vld [vmem:[#allocation5 + $0x8] sm:$0xff] }
  0x96   :  { %v33_v26 = vpop.xlane.xlu0 %32 }
  0x97   :  { %352 = vrsqrt.f32 %v37_v25  ;;  %v36_v27 = vmul.f32 0.03125, %v33_v26 }
  0x99   :  { %v38_v28 = vadd.f32 1e-06, %v36_v27 }
  0x9b   :  { %354 = vrsqrt.f32 %v38_v28 }
  0xa1   :  { %v353_v29 = vpop.eup %352 }
  0xa2   :  { %v41_v30 = vmul.f32 %v353_v29, %v22_v0 }
  0xa4   :  { %v49_v33 = vmul.f32 %v295_v31, %v41_v30 }
  0xa5   :  { %v355_v32 = vpop.eup %354 }
  0xa6   :  { %v42_v34 = vmul.f32 %v355_v32, %v23_v1  ;;  %v51_v36 = vmul.f32 0.17677669, %v49_v33 }
  0xa8   :  { %v50_v35 = vmul.f32 %v295_v31, %v42_v34  ;;  %v307_v34 = vsel %vm267_vm5, 1.0, %v368_v2 }
  0xaa   :  { %v52_v37 = vmul.f32 0.17677669, %v50_v35 }
  0xac   :  { %v53_v38 = vpack.c.bf16 %v52_v37, %v51_v36 }
  0xae   :  { %54 = vst.msk [vmem:[#allocation2] sm:$0xff] %vm27_vm0, %v53_v38 }
  0xb5   :  { %v62_v39 = vld [vmem:[#allocation2] sm:$0xff] }
  0xb6   :  { %335 = vmatmul.mubr.msk.bf16.vlgmr.msra.gmra.mrb[0].mxu0 %vm27_vm0, %v62_v39 }
 0x189   :  { %v181_v41 = vpop.f32.mrb[0].mxu0 }
 0x18a   :  { %220 = vmax.xlane.f32.xlu1 %v181_v41  ;;  %v336_v42 = vpop.f32.mrb[1].mxu0 }
 0x18b   :  { %v184_v43 = vpop.f32.mrb[2].mxu0 }
 0x18c   :  { %v337_v44 = vpop.f32.mrb[3].mxu0 }
 0x18e   :  { %222 = vmax.xlane.f32.xlu1 %v184_v43 }
 0x217   :  { %v221_v47 = vpop.xlane.xlu1 %220 }
 0x218   :  { %v226_v48 = vmax.f32 %v224_v46, %v221_v47 }
 0x21a   :  { %v230_v50 = vsub.f32 %v224_v46, %v226_v48  ;;  %262 = vst.msk [vmem:[#allocation3] sm:$0xff] %vm55_vm2, %v226_v48  ;;  %240 = vperm.xlu0 %342, %v226_v48  }
 0x21b   :  { %v223_v51 = vpop.xlane.xlu1 %222 }
 0x21c   :  { %v227_v52 = vmax.f32 %v225_v49, %v223_v51  ;;  %v232_v9 = vmul.f32 1.442695, %v230_v50 }
 0x21e   :  { %v231_v53 = vsub.f32 %v225_v49, %v227_v52  ;;  %263 = vst.msk [vmem:[#allocation3 + $0x8] sm:$0xff] %vm55_vm2, %v227_v52  ;;  %245 = vperm.xlu1 %343, %v227_v52  }
 0x220   :  { %v234_v10 = vmul.f32 1.442695, %v231_v53 }
 0x221   :  { %v273_v31 = vld [vmem:[#allocation3] sm:$0xff] }
 0x222   :  { %196 = vperm.xlu1 %343, %v466_v54  }
 0x225   :  { %v274_v38 = vld [vmem:[#allocation3 + $0x8] sm:$0xff] }
 0x226   :  { %199 = vperm.xlu1 %343, %v472_v55  }
 0x299   :  { %v241_v56 = vpop.permute.xlu0 %240 }
 0x29a   :  { %v248_v57 = vsub.f32 %v181_v41, %v241_v56 }
 0x29c   :  { %v250_v58 = vmul.f32 1.442695, %v248_v57 }
 0x29d   :  { %v246_v59 = vpop.permute.xlu1 %245 }
 0x29e   :  { %356 = vpow2.f32 %v250_v58  ;;  %v249_v61 = vsub.f32 %v184_v43, %v246_v59 }
 0x2a0   :  { %v252_v62 = vmul.f32 1.442695, %v249_v61 }
 0x2a1   :  { %v197_v0 = vpop.permute.xlu1 %196 }
 0x2a2   :  { %358 = vpow2.f32 %v252_v62  ;;  %vm201_vm3 = vcmp.eq.s32.totalorder %v191_v63, %v197_v0 }
 0x2a3   :  { %v305_v4 = vsel %vm201_vm3, 1.0, %v368_v2  ;;  %360 = vpow2.f32 %v232_v9 }
 0x2a4   :  { %v209_v5 = vmul.f32 %v305_v4, %v181_v41  ;;  %362 = vpow2.f32 %v234_v10  ;;  %v308_v41 = vsel %vm268_vm6, 1.0, %v368_v2 }
 0x2a5   :  { %v200_v1 = vpop.permute.xlu1 %199 }
 0x2a6   :  { %vm202_vm4 = vcmp.eq.s32.totalorder %v191_v63, %v200_v1 }
 0x2a7   :  { %v306_v7 = vsel %vm202_vm4, 1.0, %v368_v2 }
 0x2a8   :  { %v357_v3 = vpop.eup %356  ;;  %v210_v8 = vmul.f32 %v306_v7, %v184_v43 }
 0x2a9   :  { %254 = vadd.xlane.f32.xlu1 %v357_v3 }
 0x2ac   :  { %v359_v6 = vpop.eup %358 }
 0x2ad   :  { %256 = vadd.xlane.f32.xlu0 %v359_v6  ;;  %211 = vadd.xlane.f32.xlu1 %v209_v5  ;;  %v361_v11 = vpop.eup %360 }
 0x2ae   :  { %v236_v13 = vmul.f32 %v361_v11, %v228_v12  ;;  %v363_v14 = vpop.eup %362 }
 0x2af   :  { %v237_v19 = vmul.f32 %v363_v14, %v229_v16 }
 0x2b1   :  { %213 = vadd.xlane.f32.xlu1 %v210_v8 }
 0x336   :  { %v255_v15 = vpop.xlane.xlu1 %254 }
 0x337   :  { %v258_v17 = vadd.f32 %v255_v15, %v236_v13 }
 0x339   :  { %260 = vst.msk [vmem:[#allocation4] sm:$0xff] %vm55_vm2, %v258_v17 }
 0x33a   :  { %v257_v20 = vpop.xlane.xlu0 %256  ;;  %v212_v21 = vpop.xlane.xlu1 %211 }
 0x33b   :  { %v259_v22 = vadd.f32 %v257_v20, %v237_v19  ;;  %v215_v23 = vadd.f32 %v212_v21, %v207_v18 }
 0x33d   :  { %261 = vst.msk [vmem:[#allocation4 + $0x8] sm:$0xff] %vm55_vm2, %v259_v22  ;;  %218 = vst.msk [vmem:[#allocation5] sm:$0xff] %vm55_vm2, %v215_v23 }
 0x33e   :  { %v214_v25 = vpop.xlane.xlu1 %213 }
 0x33f   :  { %v216_v26 = vadd.f32 %v214_v25, %v208_v24 }
 0x340   :  { %v275_v27 = vld [vmem:[#allocation4] sm:$0xff] }
 0x341   :  { %364 = vlog2.f32 %v275_v27  ;;  %219 = vst.msk [vmem:[#allocation5 + $0x8] sm:$0xff] %vm55_vm2, %v216_v26 }
 0x344   :  { %v276_v28 = vld [vmem:[#allocation4 + $0x8] sm:$0xff]  ;;  %v283_v35 = vld [vmem:[#allocation5] sm:$0xff] }
 0x345   :  { %366 = vlog2.f32 %v276_v28 }
 0x348   :  { %v284_v42 = vld [vmem:[#allocation5 + $0x8] sm:$0xff] }
 0x34b   :  { %v365_v29 = vpop.eup %364 }
 0x34c   :  { %v278_v30 = vmul.f32 0.6931472, %v365_v29 }
 0x34e   :  { %v281_v32 = vadd.f32 %v278_v30, %v273_v31 }
 0x34f   :  { %v367_v33 = vpop.eup %366 }
 0x350   :  { %v285_v36 = vsub.f32 %v281_v32, %v283_v35  ;;  %v280_v37 = vmul.f32 0.6931472, %v367_v33 }
 0x352   :  { %v287_v39 = vmul.f32 %v307_v34, %v285_v36  ;;  %v282_v40 = vadd.f32 %v280_v37, %v274_v38 }
 0x354   :  { %289 = vst.msk [vmem:[%s497_s4] sm:$0xff] %vm55_vm2, %v287_v39  ;;  %v286_v43 = vsub.f32 %v282_v40, %v284_v42 }
 0x356   :  { %v288_v44 = vmul.f32 %v308_v41, %v286_v43 }
 0x358   :  { %290 = vst.msk [vmem:[%s497_s4 + $0x8] sm:$0xff] %vm55_vm2, %v288_v44 }

</bundles_post_ra>
